<compile_context>
chip_gen: v7x
topology: tpu7x:2x2x1
jax: 0.10.0
libtpu: 0.0.40
codegen_flags: <defaults>
</compile_context>

<pallas_src>
import functools

import jax
import jax.numpy as jnp
from jax import lax
from jax.experimental import pallas as pl
from jax.experimental.pallas import tpu as pltpu

# ----------------------------------------------------------------------------
# pyfoal-style constants (defined in-script at small, kernel-friendly sizes).
# ----------------------------------------------------------------------------
NUM_MELS = 16
MEL_ENCODER_WIDTHS = (32, 16)
MEL_ENCODER_KERNEL_SIZES = (3, 3, 1)          # len == len(widths) + 1
ATTENTION_WIDTH = 16
PHONEME_EMBEDDING_SIZE = 16
TEXT_ENCODER_KERNEL_SIZES = (3, 3, 3, 3, 1)   # 3 input-stack + 2 output-stack
N_PHONEMES = 40
LSTM = False                                  # TODO(synk): pyfoal.LSTM (bi-LSTM) branch not implemented; LSTM=False here.
TEMPERATURE = 0.0005
PRIOR_WEIGHT = 1.0

# mel "preprocessing" params (simplified log-mel pipeline)
WIN = 128
HOP = 64

VMEM_CAP = 64 * 1024 * 1024   # portable ceiling (v7x has 64 MiB VMEM)


def _round_up(x, m):
    return ((x + m - 1) // m) * m


# ----------------------------------------------------------------------------
# Static per-layer metadata: (kernel_size, cin, cout, relu)
# ----------------------------------------------------------------------------
def _mel_meta():
    ks, ch = MEL_ENCODER_KERNEL_SIZES, MEL_ENCODER_WIDTHS
    meta, cin = [], NUM_MELS
    for c, k in zip(ch, ks[:-1]):
        meta.append((k, cin, c, True))
        cin = c
    meta.append((ks[-1], cin, ATTENTION_WIDTH, False))
    return tuple(meta)


def _text_meta():
    ks = TEXT_ENCODER_KERNEL_SIZES
    c = PHONEME_EMBEDDING_SIZE
    return (
        (ks[0], c, c, True), (ks[1], c, c, True), (ks[2], c, c, True),   # input_stack
        (ks[3], c, 2 * c, True), (ks[4], 2 * c, ATTENTION_WIDTH, False), # output_stack
    )


MEL_META = _mel_meta()
TEXT_META = _text_meta()


# ----------------------------------------------------------------------------
# Fused conv-stack kernel: whole Sequential in one pallas_call, channels-first.
# ----------------------------------------------------------------------------
def _conv_stack_kernel(x_ref, *refs, meta, T_valid, T_pad, halo):
    """Fused 'same'-padded Conv1d(+ReLU) stack, one batch element per grid step.

    x_ref: (C0, T_pad)                         channels-first, T lane-padded
    refs : w_0 (cout, K*cin), b_0 (cout, 1), ..., o_ref (cout_last, T_pad), buf
    buf  : VMEM scratch (Cmax, T_pad + 2*halo) -- halo columns stay zero and
           provide the 'same' padding; intermediate activations never leave VMEM.
    """
    o_ref, buf = refs[-2], refs[-1]
    wb = refs[:-2]
    n_layers = len(meta)

    # Zero ONLY the halo columns; the interior is fully overwritten each layer.
    if halo > 0:
        halo_zeros = jnp.zeros((buf.shape[0], halo), jnp.float32)
        buf[:, 0:halo] = halo_zeros
        buf[:, halo + T_pad:halo + T_pad + halo] = halo_zeros

    c0 = meta[0][1]
    buf[0:c0, halo:halo + T_pad] = x_ref[...].astype(jnp.float32)

    for li, (K, cin, cout, relu) in enumerate(meta):
        w = wb[2 * li][...]            # (cout, K*cin)  -- loaded once per layer
        bias = wb[2 * li + 1][...]     # (cout, 1)
        pad_l = (K - 1) // 2
        if K == 1:
            operand = buf[0:cin, halo:halo + T_pad]
        else:
            # K shifted views stacked along sublanes -> ONE MXU matmul per layer.
            operand = jnp.concatenate(
                [buf[0:cin, halo - pad_l + k:halo - pad_l + k + T_pad]
                 for k in range(K)], axis=0)                    # (K*cin, T_pad)
        acc = jnp.dot(w, operand, preferred_element_type=jnp.float32) + bias
        if relu:
            acc = jnp.maximum(acc, 0.0)
        if li == n_layers - 1:
            o_ref[...] = acc.astype(o_ref.dtype)
        else:
            if T_pad != T_valid:
                # Keep the lane-padding region zero so it acts as 'same' padding
                # for the next layer's right-edge taps.
                col = lax.broadcasted_iota(jnp.int32, acc.shape, 1)
                acc = jnp.where(col < T_valid, acc, 0.0)
            buf[0:cout, halo:halo + T_pad] = acc   # lane-aligned, unmasked store


def conv_stack(x, layer_params, meta):
    """x: (B, T, C0) channels-last; layer_params: [(w (K,cin,cout), b (1,cout)), ...].

    Returns (B, T, cout_last) channels-last."""
    B, T, C0 = x.shape
    cout_last = meta[-1][2]
    T_pad = _round_up(T, 128)
    needs_halo = any(K > 1 for (K, _, _, _) in meta)
    halo = 128 if needs_halo else 0           # lane-aligned interior stores
    c_max = max(cin for (_, cin, _, _) in meta)

    # Channels-first, T lane-padded (wrapper-side XLA ops fuse under jit).
    x_cf = jnp.transpose(x, (0, 2, 1)).astype(jnp.float32)
    x_cf = jnp.pad(x_cf, ((0, 0), (0, 0), (0, T_pad - T)))

    args = [x_cf]
    in_specs = [pl.BlockSpec((None, C0, T_pad), lambda i: (i, 0, 0))]
    w_elems = 0
    for (w, bias_p), (K, cin, cout, _) in zip(layer_params, meta):
        # (K, cin, cout) -> (cout, K*cin); columns [k*cin:(k+1)*cin] = w[k].T
        w_packed = jnp.transpose(w, (2, 0, 1)).reshape(cout, K * cin)
        b_cf = jnp.reshape(bias_p, (cout, 1))
        args += [w_packed, b_cf]
        in_specs += [pl.BlockSpec((cout, K * cin), lambda i: (0, 0)),
                     pl.BlockSpec((cout, 1), lambda i: (0, 0))]
        w_elems += cout * K * cin + cout

    # VMEM budget derived from actual block sizes; capped for v7x (64 MiB).
    vmem_est = 4 * (c_max * (T_pad + 2 * halo)
                    + 2 * (C0 * T_pad + cout_last * T_pad + w_elems))
    vmem_limit = int(min(max(2 * vmem_est, 32 * 1024 * 1024), VMEM_CAP))

    kernel = functools.partial(_conv_stack_kernel, meta=meta,
                               T_valid=T, T_pad=T_pad, halo=halo)
    out = pl.pallas_call(
        kernel,
        out_shape=jax.ShapeDtypeStruct((B, cout_last, T_pad), jnp.float32),
        grid=(B,),
        in_specs=in_specs,
        out_specs=pl.BlockSpec((None, cout_last, T_pad), lambda i: (i, 0, 0)),
        scratch_shapes=[pltpu.VMEM((c_max, T_pad + 2 * halo), jnp.float32)],
        compiler_params=pltpu.CompilerParams(
            dimension_semantics=("parallel",),
            vmem_limit_bytes=vmem_limit),
    )(*args)
    return jnp.transpose(out, (0, 2, 1))[:, :T, :]


# ----------------------------------------------------------------------------
# Attention kernel: tiled over (batch, mel-time).
# ----------------------------------------------------------------------------
def _attention_kernel(*refs, temperature, has_prior, has_mask,
                      n_valid_keys, mask_pad_cols):
    """att[tq, tk] = -temperature * ||q[tq] - k[tk]||^2  (cross term on MXU).

    q_ref: (tq, A), k_ref: (Tk_pad, A), kk_ref: (1, Tk_pad),
    [logprior_ref: (tq, Tk_pad) bf16], [mask_ref: (tq, Tk_pad) int8],
    o_ref: (tq, Tk_pad)
    """
    q_ref, k_ref, kk_ref = refs[0], refs[1], refs[2]
    o_ref = refs[-1]
    idx = 3
    logprior_ref = mask_ref = None
    if has_prior:
        logprior_ref = refs[idx]; idx += 1
    if has_mask:
        mask_ref = refs[idx]; idx += 1

    q = q_ref[...].astype(jnp.float32)   # (tq, A)
    k = k_ref[...].astype(jnp.float32)   # (Tk_pad, A)

    qq = jnp.sum(q * q, axis=-1, keepdims=True)        # (tq, 1)
    kk = kk_ref[...]                                    # (1, Tk_pad), precomputed
    cross = jnp.dot(q, k.T, preferred_element_type=jnp.float32)
    att = -temperature * (qq + kk - 2.0 * cross)        # (tq, Tk_pad)

    if mask_pad_cols:
        # Padded key columns must not contribute to the log-softmax normalizer.
        col = lax.broadcasted_iota(jnp.int32, att.shape, 1)
        att = jnp.where(col < n_valid_keys, att, -jnp.inf)

    if has_prior:
        # log_softmax over the phoneme axis + precomputed weighted log-prior.
        m = jnp.max(att, axis=-1, keepdims=True)
        lse = m + jnp.log(jnp.sum(jnp.exp(att - m), axis=-1, keepdims=True))
        att = att - lse + logprior_ref[...].astype(jnp.float32)

    if has_mask:
        att = jnp.where(mask_ref[...] != 0, att, -jnp.inf)

    o_ref[...] = att.astype(o_ref.dtype)


def attention_pallas(q, k, prior=None, mask=None,
                     temperature=TEMPERATURE, prior_weight=PRIOR_WEIGHT):
    """q: (B, Tm, A) mel queries, k: (B, Tk, A) text keys -> (B, Tm, Tk)."""
    B, Tm, A = q.shape
    _, Tk, _ = k.shape
    has_prior = prior is not None
    has_mask = mask is not None

    # Large mel-time tile (per-step overhead amortization); phoneme axis is
    # padded to a lane multiple only when that costs < 2x write bytes (tiny Tp
    # keeps a full-extent block -- fewer HBM write bytes beats lane density).
    tq = min(512, _round_up(Tm, 8))
    Tm_pad = _round_up(Tm, tq)
    Tk_pad = _round_up(Tk, 128)
    if Tk_pad > 2 * Tk:
        Tk_pad = Tk
    mask_pad_cols = Tk_pad != Tk

    q_p = jnp.pad(q, ((0, 0), (0, Tm_pad - Tm), (0, 0)))
    k_p = jnp.pad(k, ((0, 0), (0, Tk_pad - Tk), (0, 0)))
    # ||k||^2 is identical for every mel tile of a batch: hoist it out of the grid.
    kk = jnp.sum(k_p.astype(jnp.float32) ** 2, axis=-1)[:, None, :]   # (B,1,Tk_pad)

    inputs = [q_p, k_p, kk]
    in_specs = [
        pl.BlockSpec((None, tq, A), lambda b, t: (b, t, 0)),
        pl.BlockSpec((None, Tk_pad, A), lambda b, t: (b, 0, 0)),
        pl.BlockSpec((None, 1, Tk_pad), lambda b, t: (b, 0, 0)),
    ]
    blk_bytes = 4 * (tq * A + Tk_pad * A + Tk_pad + tq * Tk_pad)
    if has_prior:
        # Precompute weighted log-prior in the wrapper, ship as bf16 (half the DMA).
        logp = (prior_weight * jnp.log(prior.astype(jnp.float32) + 1e-8)
                ).astype(jnp.bfloat16)
        logp = jnp.pad(logp, ((0, 0), (0, Tm_pad - Tm), (0, Tk_pad - Tk)))
        inputs.append(logp)
        in_specs.append(pl.BlockSpec((None, tq, Tk_pad), lambda b, t: (b, t, 0)))
        blk_bytes += 2 * tq * Tk_pad
    if has_mask:
        m8 = jnp.pad(mask.astype(jnp.int8),
                     ((0, 0), (0, Tm_pad - Tm), (0, Tk_pad - Tk)))
        inputs.append(m8)
        in_specs.append(pl.BlockSpec((None, tq, Tk_pad), lambda b, t: (b, t, 0)))
        blk_bytes += tq * Tk_pad

    vmem_limit = int(min(max(4 * blk_bytes, 32 * 1024 * 1024), VMEM_CAP))
    kernel = functools.partial(
        _attention_kernel,
        temperature=temperature,
        has_prior=has_prior, has_mask=has_mask,
        n_valid_keys=Tk, mask_pad_cols=mask_pad_cols,
    )
    out = pl.pallas_call(
        kernel,
        out_shape=jax.ShapeDtypeStruct((B, Tm_pad, Tk_pad), jnp.float32),
        grid=(B, Tm_pad // tq),
        in_specs=in_specs,
        out_specs=pl.BlockSpec((None, tq, Tk_pad), lambda b, t: (b, t, 0)),
        compiler_params=pltpu.CompilerParams(
            dimension_semantics=("parallel", "parallel"),
            vmem_limit_bytes=vmem_limit),
    )(*inputs)
    return out[:, :Tm, :Tk]


# ----------------------------------------------------------------------------
# Glue: mel "preprocessing", parameter init, model forward
# ----------------------------------------------------------------------------
def _mel_filterbank(num_mels, num_bins):
    # Simple triangular filterbank on a linear frequency axis (deterministic).
    centers = jnp.linspace(0.0, num_bins - 1, num_mels + 2)
    bins = jnp.arange(num_bins, dtype=jnp.float32)
    lo, ce, hi = centers[:-2, None], centers[1:-1, None], centers[2:, None]
    up = (bins - lo) / jnp.maximum(ce - lo, 1e-5)
    dn = (hi - bins) / jnp.maximum(hi - ce, 1e-5)
    return jnp.clip(jnp.minimum(up, dn), 0.0, 1.0)  # (num_mels, num_bins)


def mels_from_audio(audio):
    # TODO(synk): pyfoal.data.preprocess.mels.from_audio approximated with a
    # generic framed log-mel pipeline (Hann window, DFT magnitude, triangular fb).
    # audio: (B, 1, S) -> (B, n_frames, NUM_MELS)  (channels-last)
    a = audio[:, 0, :].astype(jnp.float32)
    S = a.shape[-1]
    n_frames = 1 + (S - WIN) // HOP
    idx = jnp.arange(n_frames)[:, None] * HOP + jnp.arange(WIN)[None, :]
    window = 0.5 - 0.5 * jnp.cos(2.0 * jnp.pi * jnp.arange(WIN) / WIN)
    frames = a[:, idx] * window                      # (B, F, WIN)
    n_bins = WIN // 2 + 1
    t = jnp.arange(WIN, dtype=jnp.float32)
    f = jnp.arange(n_bins, dtype=jnp.float32)
    ang = 2.0 * jnp.pi * f[:, None] * t[None, :] / WIN
    # cos and -sin stacked -> real and imaginary parts from ONE matmul.
    basis = jnp.concatenate([jnp.cos(ang), -jnp.sin(ang)], axis=0)  # (2*n_bins, WIN)
    spec = jnp.einsum("bfw,kw->bfk", frames, basis)                 # (B, F, 2*n_bins)
    re, im = spec[..., :n_bins], spec[..., n_bins:]
    mag = jnp.sqrt(re * re + im * im + 1e-9)
    mel = jnp.einsum("bfk,mk->bfm", mag, _mel_filterbank(NUM_MELS, n_bins))
    return jnp.log(jnp.clip(mel, 1e-5))              # (B, F, NUM_MELS)


def _conv_params(key, k, cin, cout):
    kw, kb = jax.random.split(key)
    scale = 1.0 / jnp.sqrt(float(k * cin))
    w = scale * jax.random.normal(kw, (k, cin, cout), dtype=jnp.float32)
    b = scale * jax.random.normal(kb, (1, cout), dtype=jnp.float32)
    return w, b


def init_params(key):
    n_layers = len(MEL_META) + len(TEXT_META)
    keys = jax.random.split(key, n_layers + 1)
    params = {"mel_encoder": [], "text_encoder": []}
    i = 0
    for (k, cin, cout, _) in MEL_META:
        params["mel_encoder"].append(_conv_params(keys[i], k, cin, cout))
        i += 1
    for (k, cin, cout, _) in TEXT_META:
        params["text_encoder"].append(_conv_params(keys[i], k, cin, cout))
        i += 1
    params["embedding"] = 0.1 * jax.random.normal(
        keys[i], (N_PHONEMES, PHONEME_EMBEDDING_SIZE), dtype=jnp.float32)
    return params


def model_forward(params, phonemes, audio, prior=None, mask=None):
    """phonemes: (B, 1, Tp) int32, audio: (B, 1, S) float32 -> (B, Tm, Tp)."""
    # Query path: audio -> log-mels -> fused MelEncoder conv stack (one kernel).
    mels = mels_from_audio(audio)                        # (B, Tm, NUM_MELS)
    queries = conv_stack(mels, params["mel_encoder"], MEL_META)

    # Key path: embedding lookup (glue) -> fused TextEncoder conv stack (one kernel).
    emb = params["embedding"][phonemes[:, 0, :]]         # (B, Tp, EMB)
    keys_ = conv_stack(emb, params["text_encoder"], TEXT_META)

    # Attention: -TEMPERATURE * ||q - k||^2, optional log_softmax + prior, mask.
    return attention_pallas(queries, keys_, prior=prior, mask=mask)


# ----------------------------------------------------------------------------
# Demo
# ----------------------------------------------------------------------------
if __name__ == "__main__":
    key = jax.random.PRNGKey(0)
    k_param, k_aud, k_phon, k_prior, k_mask = jax.random.split(key, 5)

    params = init_params(k_param)

    B = 2
    S = WIN + 7 * HOP            # -> 8 mel frames
    Tp = 8                       # phoneme sequence length

    audio = jax.random.normal(k_aud, (B, 1, S), dtype=jnp.float32)
    phonemes = jax.random.randint(k_phon, (B, 1, Tp), 0, N_PHONEMES, dtype=jnp.int32)
    Tm = 1 + (S - WIN) // HOP
    prior = jax.random.uniform(k_prior, (B, Tm, Tp), dtype=jnp.float32) + 0.1
    mask = jax.random.uniform(k_mask, (B, Tm, Tp)) > 0.1  # bool mask

    fwd = jax.jit(model_forward)
    out = fwd(params, phonemes, audio, prior, mask)
    out = jax.block_until_ready(out)
    assert out.shape == (B, Tm, Tp), out.shape
    print("KERNEL_OK")
</pallas_src>

<mosaic_0001>
module attributes {stable_mosaic.version = 11 : i64} {
  func.func @_conv_stack_kernel(%arg0: i32, %arg1: memref<1x16x128xf32, #tpu.memory_space<vmem>>, %arg2: memref<32x48xf32, #tpu.memory_space<vmem>>, %arg3: memref<32x1xf32, #tpu.memory_space<vmem>>, %arg4: memref<16x96xf32, #tpu.memory_space<vmem>>, %arg5: memref<16x1xf32, #tpu.memory_space<vmem>>, %arg6: memref<16x16xf32, #tpu.memory_space<vmem>>, %arg7: memref<16x1xf32, #tpu.memory_space<vmem>>, %arg8: memref<1x16x128xf32, #tpu.memory_space<vmem>>, %arg9: memref<32x384xf32, #tpu.memory_space<vmem>>) attributes {dimension_semantics = [#tpu.dimension_semantics<parallel>], iteration_bounds = array<i64: 2>, scalar_prefetch = 0 : i64, scratch_operands = 1 : i64, tpu.core_type = #tpu.core_type<tc>, window_params = [{transform_indices = @transform_0, window_bounds = array<i64: 1, 16, 128>}, {pipeline_mode = #tpu.pipeline_mode<synchronous>, transform_indices = @transform_1, window_bounds = array<i64: 32, 48>}, {pipeline_mode = #tpu.pipeline_mode<synchronous>, transform_indices = @transform_2, window_bounds = array<i64: 32, 1>}, {pipeline_mode = #tpu.pipeline_mode<synchronous>, transform_indices = @transform_3, window_bounds = array<i64: 16, 96>}, {pipeline_mode = #tpu.pipeline_mode<synchronous>, transform_indices = @transform_4, window_bounds = array<i64: 16, 1>}, {pipeline_mode = #tpu.pipeline_mode<synchronous>, transform_indices = @transform_5, window_bounds = array<i64: 16, 16>}, {pipeline_mode = #tpu.pipeline_mode<synchronous>, transform_indices = @transform_6, window_bounds = array<i64: 16, 1>}, {transform_indices = @transform_7, window_bounds = array<i64: 1, 16, 128>}]} {
    %cst = arith.constant 0.000000e+00 : f32
    %0 = vector.broadcast %cst : f32 to vector<32x128xf32>
    %c0 = arith.constant 0 : index
    %c0_0 = arith.constant 0 : index
    %1 = vector.load %arg9[%c0, %c0_0] : memref<32x384xf32, #tpu.memory_space<vmem>>, vector<32x128xf32>
    tpu.vector_store %arg9[%c0, %c0_0], %0 {strides = array<i32>} : memref<32x384xf32, #tpu.memory_space<vmem>>, vector<32x128xf32>,
    %c0_1 = arith.constant 0 : index
    %c256 = arith.constant 256 : index
    %2 = vector.load %arg9[%c0_1, %c256] : memref<32x384xf32, #tpu.memory_space<vmem>>, vector<32x128xf32>
    tpu.vector_store %arg9[%c0_1, %c256], %0 {strides = array<i32>} : memref<32x384xf32, #tpu.memory_space<vmem>>, vector<32x128xf32>,
    %c0_2 = arith.constant 0 : index
    %c0_3 = arith.constant 0 : index
    %c0_4 = arith.constant 0 : index
    %3 = vector.load %arg1[%c0_2, %c0_3, %c0_4] : memref<1x16x128xf32, #tpu.memory_space<vmem>>, vector<1x16x128xf32>
    %4 = vector.shape_cast %3 : vector<1x16x128xf32> to vector<16x128xf32>
    %c0_5 = arith.constant 0 : index
    %c128 = arith.constant 128 : index
    %5 = vector.load %arg9[%c0_5, %c128] : memref<32x384xf32, #tpu.memory_space<vmem>>, vector<16x128xf32>
    tpu.vector_store %arg9[%c0_5, %c128], %4 {strides = array<i32>} : memref<32x384xf32, #tpu.memory_space<vmem>>, vector<16x128xf32>,
    %c0_6 = arith.constant 0 : index
    %c0_7 = arith.constant 0 : index
    %6 = vector.load %arg2[%c0_6, %c0_7] : memref<32x48xf32, #tpu.memory_space<vmem>>, vector<32x48xf32>
    %c0_8 = arith.constant 0 : index
    %c0_9 = arith.constant 0 : index
    %7 = vector.load %arg3[%c0_8, %c0_9] : memref<32x1xf32, #tpu.memory_space<vmem>>, vector<32x1xf32>
    %c0_10 = arith.constant 0 : index
    %c127 = arith.constant 127 : index
    %8 = vector.load %arg9[%c0_10, %c127] : memref<32x384xf32, #tpu.memory_space<vmem>>, vector<16x128xf32>
    %c0_11 = arith.constant 0 : index
    %c128_12 = arith.constant 128 : index
    %9 = vector.load %arg9[%c0_11, %c128_12] : memref<32x384xf32, #tpu.memory_space<vmem>>, vector<16x128xf32>
    %c0_13 = arith.constant 0 : index
    %c129 = arith.constant 129 : index
    %10 = vector.load %arg9[%c0_13, %c129] : memref<32x384xf32, #tpu.memory_space<vmem>>, vector<16x128xf32>
    %11 = tpu.concatenate %8, %9, %10 in 0 : vector<16x128xf32>, vector<16x128xf32>, vector<16x128xf32> -> vector<48x128xf32>
    %cst_14 = arith.constant dense<0.000000e+00> : vector<32x128xf32>
    %12 = tpu.matmul %6, %11, %cst_14 {dimension_numbers = #tpu.dot_dimension_numbers<[1], [0], [0], [1], [0, 0, 1, 1], [], []>} : vector<32x48xf32>, vector<48x128xf32>, vector<32x128xf32> -> vector<32x128xf32>
    %13 = vector.broadcast %7 : vector<32x1xf32> to vector<32x128xf32>
    %14 = arith.addf %12, %13 : vector<32x128xf32>
    %cst_15 = arith.constant 0.000000e+00 : f32
    %15 = vector.broadcast %cst_15 : f32 to vector<32x128xf32>
    %16 = arith.maximumf %14, %15 : vector<32x128xf32>
    %17 = tpu.iota {dimensions = array<i32: 1>} : vector<32x128xi32>
    %c8_i32 = arith.constant 8 : i32
    %18 = vector.broadcast %c8_i32 : i32 to vector<32x128xi32>
    %19 = arith.cmpi slt, %17, %18 : vector<32x128xi32>
    %cst_16 = arith.constant 0.000000e+00 : f32
    %20 = vector.broadcast %cst_16 : f32 to vector<32x128xf32>
    %21 = arith.select %19, %16, %20 : vector<32x128xi1>, vector<32x128xf32>
    %c0_17 = arith.constant 0 : index
    %c128_18 = arith.constant 128 : index
    %22 = vector.load %arg9[%c0_17, %c128_18] : memref<32x384xf32, #tpu.memory_space<vmem>>, vector<32x128xf32>
    tpu.vector_store %arg9[%c0_17, %c128_18], %21 {strides = array<i32>} : memref<32x384xf32, #tpu.memory_space<vmem>>, vector<32x128xf32>,
    %c0_19 = arith.constant 0 : index
    %c0_20 = arith.constant 0 : index
    %23 = vector.load %arg4[%c0_19, %c0_20] : memref<16x96xf32, #tpu.memory_space<vmem>>, vector<16x96xf32>
    %c0_21 = arith.constant 0 : index
    %c0_22 = arith.constant 0 : index
    %24 = vector.load %arg5[%c0_21, %c0_22] : memref<16x1xf32, #tpu.memory_space<vmem>>, vector<16x1xf32>
    %c0_23 = arith.constant 0 : index
    %c127_24 = arith.constant 127 : index
    %25 = vector.load %arg9[%c0_23, %c127_24] : memref<32x384xf32, #tpu.memory_space<vmem>>, vector<32x128xf32>
    %c0_25 = arith.constant 0 : index
    %c128_26 = arith.constant 128 : index
    %26 = vector.load %arg9[%c0_25, %c128_26] : memref<32x384xf32, #tpu.memory_space<vmem>>, vector<32x128xf32>
    %c0_27 = arith.constant 0 : index
    %c129_28 = arith.constant 129 : index
    %27 = vector.load %arg9[%c0_27, %c129_28] : memref<32x384xf32, #tpu.memory_space<vmem>>, vector<32x128xf32>
    %28 = tpu.concatenate %25, %26, %27 in 0 : vector<32x128xf32>, vector<32x128xf32>, vector<32x128xf32> -> vector<96x128xf32>
    %cst_29 = arith.constant dense<0.000000e+00> : vector<16x128xf32>
    %29 = tpu.matmul %23, %28, %cst_29 {dimension_numbers = #tpu.dot_dimension_numbers<[1], [0], [0], [1], [0, 0, 1, 1], [], []>} : vector<16x96xf32>, vector<96x128xf32>, vector<16x128xf32> -> vector<16x128xf32>
    %30 = vector.broadcast %24 : vector<16x1xf32> to vector<16x128xf32>
    %31 = arith.addf %29, %30 : vector<16x128xf32>
    %cst_30 = arith.constant 0.000000e+00 : f32
    %32 = vector.broadcast %cst_30 : f32 to vector<16x128xf32>
    %33 = arith.maximumf %31, %32 : vector<16x128xf32>
    %34 = tpu.iota {dimensions = array<i32: 1>} : vector<16x128xi32>
    %c8_i32_31 = arith.constant 8 : i32
    %35 = vector.broadcast %c8_i32_31 : i32 to vector<16x128xi32>
    %36 = arith.cmpi slt, %34, %35 : vector<16x128xi32>
    %cst_32 = arith.constant 0.000000e+00 : f32
    %37 = vector.broadcast %cst_32 : f32 to vector<16x128xf32>
    %38 = arith.select %36, %33, %37 : vector<16x128xi1>, vector<16x128xf32>
    %c0_33 = arith.constant 0 : index
    %c128_34 = arith.constant 128 : index
    %39 = vector.load %arg9[%c0_33, %c128_34] : memref<32x384xf32, #tpu.memory_space<vmem>>, vector<16x128xf32>
    tpu.vector_store %arg9[%c0_33, %c128_34], %38 {strides = array<i32>} : memref<32x384xf32, #tpu.memory_space<vmem>>, vector<16x128xf32>,
    %c0_35 = arith.constant 0 : index
    %c0_36 = arith.constant 0 : index
    %40 = vector.load %arg6[%c0_35, %c0_36] : memref<16x16xf32, #tpu.memory_space<vmem>>, vector<16x16xf32>
    %c0_37 = arith.constant 0 : index
    %c0_38 = arith.constant 0 : index
    %41 = vector.load %arg7[%c0_37, %c0_38] : memref<16x1xf32, #tpu.memory_space<vmem>>, vector<16x1xf32>
    %c0_39 = arith.constant 0 : index
    %c128_40 = arith.constant 128 : index
    %42 = vector.load %arg9[%c0_39, %c128_40] : memref<32x384xf32, #tpu.memory_space<vmem>>, vector<16x128xf32>
    %cst_41 = arith.constant dense<0.000000e+00> : vector<16x128xf32>
    %43 = tpu.matmul %40, %42, %cst_41 {dimension_numbers = #tpu.dot_dimension_numbers<[1], [0], [0], [1], [0, 0, 1, 1], [], []>} : vector<16x16xf32>, vector<16x128xf32>, vector<16x128xf32> -> vector<16x128xf32>
    %44 = vector.broadcast %41 : vector<16x1xf32> to vector<16x128xf32>
    %45 = arith.addf %43, %44 : vector<16x128xf32>
    %c0_42 = arith.constant 0 : index
    %c0_43 = arith.constant 0 : index
    %c0_44 = arith.constant 0 : index
    %46 = vector.load %arg8[%c0_42, %c0_43, %c0_44] : memref<1x16x128xf32, #tpu.memory_space<vmem>>, vector<1x16x128xf32>
    %47 = vector.shape_cast %46 : vector<1x16x128xf32> to vector<16x128xf32>
    %48 = vector.shape_cast %45 : vector<16x128xf32> to vector<1x16x128xf32>
    tpu.vector_store %arg8[%c0_42, %c0_43, %c0_44], %48 {strides = array<i32>} : memref<1x16x128xf32, #tpu.memory_space<vmem>>, vector<1x16x128xf32>,
    return
  }
  func.func @transform_0(%arg0: i32) -> (i32, i32, i32) {
    %c0_i32 = arith.constant 0 : i32
    %c0_i32_0 = arith.constant 0 : i32
    %c0_i32_1 = arith.constant 0 : i32
    return %arg0, %c0_i32, %c0_i32_0 : i32, i32, i32
  }
  func.func @transform_1(%arg0: i32) -> (i32, i32) {
    %c0_i32 = arith.constant 0 : i32
    %c0_i32_0 = arith.constant 0 : i32
    %c0_i32_1 = arith.constant 0 : i32
    return %c0_i32, %c0_i32_0 : i32, i32
  }
  func.func @transform_2(%arg0: i32) -> (i32, i32) {
    %c0_i32 = arith.constant 0 : i32
    %c0_i32_0 = arith.constant 0 : i32
    %c0_i32_1 = arith.constant 0 : i32
    return %c0_i32, %c0_i32_0 : i32, i32
  }
  func.func @transform_3(%arg0: i32) -> (i32, i32) {
    %c0_i32 = arith.constant 0 : i32
    %c0_i32_0 = arith.constant 0 : i32
    %c0_i32_1 = arith.constant 0 : i32
    return %c0_i32, %c0_i32_0 : i32, i32
  }
  func.func @transform_4(%arg0: i32) -> (i32, i32) {
    %c0_i32 = arith.constant 0 : i32
    %c0_i32_0 = arith.constant 0 : i32
    %c0_i32_1 = arith.constant 0 : i32
    return %c0_i32, %c0_i32_0 : i32, i32
  }
  func.func @transform_5(%arg0: i32) -> (i32, i32) {
    %c0_i32 = arith.constant 0 : i32
    %c0_i32_0 = arith.constant 0 : i32
    %c0_i32_1 = arith.constant 0 : i32
    return %c0_i32, %c0_i32_0 : i32, i32
  }
  func.func @transform_6(%arg0: i32) -> (i32, i32) {
    %c0_i32 = arith.constant 0 : i32
    %c0_i32_0 = arith.constant 0 : i32
    %c0_i32_1 = arith.constant 0 : i32
    return %c0_i32, %c0_i32_0 : i32, i32
  }
  func.func @transform_7(%arg0: i32) -> (i32, i32, i32) {
    %c0_i32 = arith.constant 0 : i32
    %c0_i32_0 = arith.constant 0 : i32
    %c0_i32_1 = arith.constant 0 : i32
    return %arg0, %c0_i32, %c0_i32_0 : i32, i32, i32
  }
}

module attributes {stable_mosaic.version = 11 : i64} {
  func.func @_conv_stack_kernel(%arg0: i32, %arg1: memref<1x16x128xf32, #tpu.memory_space<vmem>>, %arg2: memref<16x48xf32, #tpu.memory_space<vmem>>, %arg3: memref<16x1xf32, #tpu.memory_space<vmem>>, %arg4: memref<16x48xf32, #tpu.memory_space<vmem>>, %arg5: memref<16x1xf32, #tpu.memory_space<vmem>>, %arg6: memref<16x48xf32, #tpu.memory_space<vmem>>, %arg7: memref<16x1xf32, #tpu.memory_space<vmem>>, %arg8: memref<32x48xf32, #tpu.memory_space<vmem>>, %arg9: memref<32x1xf32, #tpu.memory_space<vmem>>, %arg10: memref<16x32xf32, #tpu.memory_space<vmem>>, %arg11: memref<16x1xf32, #tpu.memory_space<vmem>>, %arg12: memref<1x16x128xf32, #tpu.memory_space<vmem>>, %arg13: memref<32x384xf32, #tpu.memory_space<vmem>>) attributes {dimension_semantics = [#tpu.dimension_semantics<parallel>], iteration_bounds = array<i64: 2>, scalar_prefetch = 0 : i64, scratch_operands = 1 : i64, tpu.core_type = #tpu.core_type<tc>, window_params = [{transform_indices = @transform_0, window_bounds = array<i64: 1, 16, 128>}, {pipeline_mode = #tpu.pipeline_mode<synchronous>, transform_indices = @transform_1, window_bounds = array<i64: 16, 48>}, {pipeline_mode = #tpu.pipeline_mode<synchronous>, transform_indices = @transform_2, window_bounds = array<i64: 16, 1>}, {pipeline_mode = #tpu.pipeline_mode<synchronous>, transform_indices = @transform_3, window_bounds = array<i64: 16, 48>}, {pipeline_mode = #tpu.pipeline_mode<synchronous>, transform_indices = @transform_4, window_bounds = array<i64: 16, 1>}, {pipeline_mode = #tpu.pipeline_mode<synchronous>, transform_indices = @transform_5, window_bounds = array<i64: 16, 48>}, {pipeline_mode = #tpu.pipeline_mode<synchronous>, transform_indices = @transform_6, window_bounds = array<i64: 16, 1>}, {pipeline_mode = #tpu.pipeline_mode<synchronous>, transform_indices = @transform_7, window_bounds = array<i64: 32, 48>}, {pipeline_mode = #tpu.pipeline_mode<synchronous>, transform_indices = @transform_8, window_bounds = array<i64: 32, 1>}, {pipeline_mode = #tpu.pipeline_mode<synchronous>, transform_indices = @transform_9, window_bounds = array<i64: 16, 32>}, {pipeline_mode = #tpu.pipeline_mode<synchronous>, transform_indices = @transform_10, window_bounds = array<i64: 16, 1>}, {transform_indices = @transform_11, window_bounds = array<i64: 1, 16, 128>}]} {
    %cst = arith.constant 0.000000e+00 : f32
    %0 = vector.broadcast %cst : f32 to vector<32x128xf32>
    %c0 = arith.constant 0 : index
    %c0_0 = arith.constant 0 : index
    %1 = vector.load %arg13[%c0, %c0_0] : memref<32x384xf32, #tpu.memory_space<vmem>>, vector<32x128xf32>
    tpu.vector_store %arg13[%c0, %c0_0], %0 {strides = array<i32>} : memref<32x384xf32, #tpu.memory_space<vmem>>, vector<32x128xf32>,
    %c0_1 = arith.constant 0 : index
    %c256 = arith.constant 256 : index
    %2 = vector.load %arg13[%c0_1, %c256] : memref<32x384xf32, #tpu.memory_space<vmem>>, vector<32x128xf32>
    tpu.vector_store %arg13[%c0_1, %c256], %0 {strides = array<i32>} : memref<32x384xf32, #tpu.memory_space<vmem>>, vector<32x128xf32>,
    %c0_2 = arith.constant 0 : index
    %c0_3 = arith.constant 0 : index
    %c0_4 = arith.constant 0 : index
    %3 = vector.load %arg1[%c0_2, %c0_3, %c0_4] : memref<1x16x128xf32, #tpu.memory_space<vmem>>, vector<1x16x128xf32>
    %4 = vector.shape_cast %3 : vector<1x16x128xf32> to vector<16x128xf32>
    %c0_5 = arith.constant 0 : index
    %c128 = arith.constant 128 : index
    %5 = vector.load %arg13[%c0_5, %c128] : memref<32x384xf32, #tpu.memory_space<vmem>>, vector<16x128xf32>
    tpu.vector_store %arg13[%c0_5, %c128], %4 {strides = array<i32>} : memref<32x384xf32, #tpu.memory_space<vmem>>, vector<16x128xf32>,
    %c0_6 = arith.constant 0 : index
    %c0_7 = arith.constant 0 : index
    %6 = vector.load %arg2[%c0_6, %c0_7] : memref<16x48xf32, #tpu.memory_space<vmem>>, vector<16x48xf32>
    %c0_8 = arith.constant 0 : index
    %c0_9 = arith.constant 0 : index
    %7 = vector.load %arg3[%c0_8, %c0_9] : memref<16x1xf32, #tpu.memory_space<vmem>>, vector<16x1xf32>
    %c0_10 = arith.constant 0 : index
    %c127 = arith.constant 127 : index
    %8 = vector.load %arg13[%c0_10, %c127] : memref<32x384xf32, #tpu.memory_space<vmem>>, vector<16x128xf32>
    %c0_11 = arith.constant 0 : index
    %c128_12 = arith.constant 128 : index
    %9 = vector.load %arg13[%c0_11, %c128_12] : memref<32x384xf32, #tpu.memory_space<vmem>>, vector<16x128xf32>
    %c0_13 = arith.constant 0 : index
    %c129 = arith.constant 129 : index
    %10 = vector.load %arg13[%c0_13, %c129] : memref<32x384xf32, #tpu.memory_space<vmem>>, vector<16x128xf32>
    %11 = tpu.concatenate %8, %9, %10 in 0 : vector<16x128xf32>, vector<16x128xf32>, vector<16x128xf32> -> vector<48x128xf32>
    %cst_14 = arith.constant dense<0.000000e+00> : vector<16x128xf32>
    %12 = tpu.matmul %6, %11, %cst_14 {dimension_numbers = #tpu.dot_dimension_numbers<[1], [0], [0], [1], [0, 0, 1, 1], [], []>} : vector<16x48xf32>, vector<48x128xf32>, vector<16x128xf32> -> vector<16x128xf32>
    %13 = vector.broadcast %7 : vector<16x1xf32> to vector<16x128xf32>
    %14 = arith.addf %12, %13 : vector<16x128xf32>
    %cst_15 = arith.constant 0.000000e+00 : f32
    %15 = vector.broadcast %cst_15 : f32 to vector<16x128xf32>
    %16 = arith.maximumf %14, %15 : vector<16x128xf32>
    %17 = tpu.iota {dimensions = array<i32: 1>} : vector<16x128xi32>
    %c8_i32 = arith.constant 8 : i32
    %18 = vector.broadcast %c8_i32 : i32 to vector<16x128xi32>
    %19 = arith.cmpi slt, %17, %18 : vector<16x128xi32>
    %cst_16 = arith.constant 0.000000e+00 : f32
    %20 = vector.broadcast %cst_16 : f32 to vector<16x128xf32>
    %21 = arith.select %19, %16, %20 : vector<16x128xi1>, vector<16x128xf32>
    %c0_17 = arith.constant 0 : index
    %c128_18 = arith.constant 128 : index
    %22 = vector.load %arg13[%c0_17, %c128_18] : memref<32x384xf32, #tpu.memory_space<vmem>>, vector<16x128xf32>
    tpu.vector_store %arg13[%c0_17, %c128_18], %21 {strides = array<i32>} : memref<32x384xf32, #tpu.memory_space<vmem>>, vector<16x128xf32>,
    %c0_19 = arith.constant 0 : index
    %c0_20 = arith.constant 0 : index
    %23 = vector.load %arg4[%c0_19, %c0_20] : memref<16x48xf32, #tpu.memory_space<vmem>>, vector<16x48xf32>
    %c0_21 = arith.constant 0 : index
    %c0_22 = arith.constant 0 : index
    %24 = vector.load %arg5[%c0_21, %c0_22] : memref<16x1xf32, #tpu.memory_space<vmem>>, vector<16x1xf32>
    %c0_23 = arith.constant 0 : index
    %c127_24 = arith.constant 127 : index
    %25 = vector.load %arg13[%c0_23, %c127_24] : memref<32x384xf32, #tpu.memory_space<vmem>>, vector<16x128xf32>
    %c0_25 = arith.constant 0 : index
    %c128_26 = arith.constant 128 : index
    %26 = vector.load %arg13[%c0_25, %c128_26] : memref<32x384xf32, #tpu.memory_space<vmem>>, vector<16x128xf32>
    %c0_27 = arith.constant 0 : index
    %c129_28 = arith.constant 129 : index
    %27 = vector.load %arg13[%c0_27, %c129_28] : memref<32x384xf32, #tpu.memory_space<vmem>>, vector<16x128xf32>
    %28 = tpu.concatenate %25, %26, %27 in 0 : vector<16x128xf32>, vector<16x128xf32>, vector<16x128xf32> -> vector<48x128xf32>
    %cst_29 = arith.constant dense<0.000000e+00> : vector<16x128xf32>
    %29 = tpu.matmul %23, %28, %cst_29 {dimension_numbers = #tpu.dot_dimension_numbers<[1], [0], [0], [1], [0, 0, 1, 1], [], []>} : vector<16x48xf32>, vector<48x128xf32>, vector<16x128xf32> -> vector<16x128xf32>
    %30 = vector.broadcast %24 : vector<16x1xf32> to vector<16x128xf32>
    %31 = arith.addf %29, %30 : vector<16x128xf32>
    %cst_30 = arith.constant 0.000000e+00 : f32
    %32 = vector.broadcast %cst_30 : f32 to vector<16x128xf32>
    %33 = arith.maximumf %31, %32 : vector<16x128xf32>
    %34 = tpu.iota {dimensions = array<i32: 1>} : vector<16x128xi32>
    %c8_i32_31 = arith.constant 8 : i32
    %35 = vector.broadcast %c8_i32_31 : i32 to vector<16x128xi32>
    %36 = arith.cmpi slt, %34, %35 : vector<16x128xi32>
    %cst_32 = arith.constant 0.000000e+00 : f32
    %37 = vector.broadcast %cst_32 : f32 to vector<16x128xf32>
    %38 = arith.select %36, %33, %37 : vector<16x128xi1>, vector<16x128xf32>
    %c0_33 = arith.constant 0 : index
    %c128_34 = arith.constant 128 : index
    %39 = vector.load %arg13[%c0_33, %c128_34] : memref<32x384xf32, #tpu.memory_space<vmem>>, vector<16x128xf32>
    tpu.vector_store %arg13[%c0_33, %c128_34], %38 {strides = array<i32>} : memref<32x384xf32, #tpu.memory_space<vmem>>, vector<16x128xf32>,
    %c0_35 = arith.constant 0 : index
    %c0_36 = arith.constant 0 : index
    %40 = vector.load %arg6[%c0_35, %c0_36] : memref<16x48xf32, #tpu.memory_space<vmem>>, vector<16x48xf32>
    %c0_37 = arith.constant 0 : index
    %c0_38 = arith.constant 0 : index
    %41 = vector.load %arg7[%c0_37, %c0_38] : memref<16x1xf32, #tpu.memory_space<vmem>>, vector<16x1xf32>
    %c0_39 = arith.constant 0 : index
    %c127_40 = arith.constant 127 : index
    %42 = vector.load %arg13[%c0_39, %c127_40] : memref<32x384xf32, #tpu.memory_space<vmem>>, vector<16x128xf32>
    %c0_41 = arith.constant 0 : index
    %c128_42 = arith.constant 128 : index
    %43 = vector.load %arg13[%c0_41, %c128_42] : memref<32x384xf32, #tpu.memory_space<vmem>>, vector<16x128xf32>
    %c0_43 = arith.constant 0 : index
    %c129_44 = arith.constant 129 : index
    %44 = vector.load %arg13[%c0_43, %c129_44] : memref<32x384xf32, #tpu.memory_space<vmem>>, vector<16x128xf32>
    %45 = tpu.concatenate %42, %43, %44 in 0 : vector<16x128xf32>, vector<16x128xf32>, vector<16x128xf32> -> vector<48x128xf32>
    %cst_45 = arith.constant dense<0.000000e+00> : vector<16x128xf32>
    %46 = tpu.matmul %40, %45, %cst_45 {dimension_numbers = #tpu.dot_dimension_numbers<[1], [0], [0], [1], [0, 0, 1, 1], [], []>} : vector<16x48xf32>, vector<48x128xf32>, vector<16x128xf32> -> vector<16x128xf32>
    %47 = vector.broadcast %41 : vector<16x1xf32> to vector<16x128xf32>
    %48 = arith.addf %46, %47 : vector<16x128xf32>
    %cst_46 = arith.constant 0.000000e+00 : f32
    %49 = vector.broadcast %cst_46 : f32 to vector<16x128xf32>
    %50 = arith.maximumf %48, %49 : vector<16x128xf32>
    %51 = tpu.iota {dimensions = array<i32: 1>} : vector<16x128xi32>
    %c8_i32_47 = arith.constant 8 : i32
    %52 = vector.broadcast %c8_i32_47 : i32 to vector<16x128xi32>
    %53 = arith.cmpi slt, %51, %52 : vector<16x128xi32>
    %cst_48 = arith.constant 0.000000e+00 : f32
    %54 = vector.broadcast %cst_48 : f32 to vector<16x128xf32>
    %55 = arith.select %53, %50, %54 : vector<16x128xi1>, vector<16x128xf32>
    %c0_49 = arith.constant 0 : index
    %c128_50 = arith.constant 128 : index
    %56 = vector.load %arg13[%c0_49, %c128_50] : memref<32x384xf32, #tpu.memory_space<vmem>>, vector<16x128xf32>
    tpu.vector_store %arg13[%c0_49, %c128_50], %55 {strides = array<i32>} : memref<32x384xf32, #tpu.memory_space<vmem>>, vector<16x128xf32>,
    %c0_51 = arith.constant 0 : index
    %c0_52 = arith.constant 0 : index
    %57 = vector.load %arg8[%c0_51, %c0_52] : memref<32x48xf32, #tpu.memory_space<vmem>>, vector<32x48xf32>
    %c0_53 = arith.constant 0 : index
    %c0_54 = arith.constant 0 : index
    %58 = vector.load %arg9[%c0_53, %c0_54] : memref<32x1xf32, #tpu.memory_space<vmem>>, vector<32x1xf32>
    %c0_55 = arith.constant 0 : index
    %c127_56 = arith.constant 127 : index
    %59 = vector.load %arg13[%c0_55, %c127_56] : memref<32x384xf32, #tpu.memory_space<vmem>>, vector<16x128xf32>
    %c0_57 = arith.constant 0 : index
    %c128_58 = arith.constant 128 : index
    %60 = vector.load %arg13[%c0_57, %c128_58] : memref<32x384xf32, #tpu.memory_space<vmem>>, vector<16x128xf32>
    %c0_59 = arith.constant 0 : index
    %c129_60 = arith.constant 129 : index
    %61 = vector.load %arg13[%c0_59, %c129_60] : memref<32x384xf32, #tpu.memory_space<vmem>>, vector<16x128xf32>
    %62 = tpu.concatenate %59, %60, %61 in 0 : vector<16x128xf32>, vector<16x128xf32>, vector<16x128xf32> -> vector<48x128xf32>
    %cst_61 = arith.constant dense<0.000000e+00> : vector<32x128xf32>
    %63 = tpu.matmul %57, %62, %cst_61 {dimension_numbers = #tpu.dot_dimension_numbers<[1], [0], [0], [1], [0, 0, 1, 1], [], []>} : vector<32x48xf32>, vector<48x128xf32>, vector<32x128xf32> -> vector<32x128xf32>
    %64 = vector.broadcast %58 : vector<32x1xf32> to vector<32x128xf32>
    %65 = arith.addf %63, %64 : vector<32x128xf32>
    %cst_62 = arith.constant 0.000000e+00 : f32
    %66 = vector.broadcast %cst_62 : f32 to vector<32x128xf32>
    %67 = arith.maximumf %65, %66 : vector<32x128xf32>
    %68 = tpu.iota {dimensions = array<i32: 1>} : vector<32x128xi32>
    %c8_i32_63 = arith.constant 8 : i32
    %69 = vector.broadcast %c8_i32_63 : i32 to vector<32x128xi32>
    %70 = arith.cmpi slt, %68, %69 : vector<32x128xi32>
    %cst_64 = arith.constant 0.000000e+00 : f32
    %71 = vector.broadcast %cst_64 : f32 to vector<32x128xf32>
    %72 = arith.select %70, %67, %71 : vector<32x128xi1>, vector<32x128xf32>
    %c0_65 = arith.constant 0 : index
    %c128_66 = arith.constant 128 : index
    %73 = vector.load %arg13[%c0_65, %c128_66] : memref<32x384xf32, #tpu.memory_space<vmem>>, vector<32x128xf32>
    tpu.vector_store %arg13[%c0_65, %c128_66], %72 {strides = array<i32>} : memref<32x384xf32, #tpu.memory_space<vmem>>, vector<32x128xf32>,
    %c0_67 = arith.constant 0 : index
    %c0_68 = arith.constant 0 : index
    %74 = vector.load %arg10[%c0_67, %c0_68] : memref<16x32xf32, #tpu.memory_space<vmem>>, vector<16x32xf32>
    %c0_69 = arith.constant 0 : index
    %c0_70 = arith.constant 0 : index
    %75 = vector.load %arg11[%c0_69, %c0_70] : memref<16x1xf32, #tpu.memory_space<vmem>>, vector<16x1xf32>
    %c0_71 = arith.constant 0 : index
    %c128_72 = arith.constant 128 : index
    %76 = vector.load %arg13[%c0_71, %c128_72] : memref<32x384xf32, #tpu.memory_space<vmem>>, vector<32x128xf32>
    %cst_73 = arith.constant dense<0.000000e+00> : vector<16x128xf32>
    %77 = tpu.matmul %74, %76, %cst_73 {dimension_numbers = #tpu.dot_dimension_numbers<[1], [0], [0], [1], [0, 0, 1, 1], [], []>} : vector<16x32xf32>, vector<32x128xf32>, vector<16x128xf32> -> vector<16x128xf32>
    %78 = vector.broadcast %75 : vector<16x1xf32> to vector<16x128xf32>
    %79 = arith.addf %77, %78 : vector<16x128xf32>
    %c0_74 = arith.constant 0 : index
    %c0_75 = arith.constant 0 : index
    %c0_76 = arith.constant 0 : index
    %80 = vector.load %arg12[%c0_74, %c0_75, %c0_76] : memref<1x16x128xf32, #tpu.memory_space<vmem>>, vector<1x16x128xf32>
    %81 = vector.shape_cast %80 : vector<1x16x128xf32> to vector<16x128xf32>
    %82 = vector.shape_cast %79 : vector<16x128xf32> to vector<1x16x128xf32>
    tpu.vector_store %arg12[%c0_74, %c0_75, %c0_76], %82 {strides = array<i32>} : memref<1x16x128xf32, #tpu.memory_space<vmem>>, vector<1x16x128xf32>,
    return
  }
  func.func @transform_0(%arg0: i32) -> (i32, i32, i32) {
    %c0_i32 = arith.constant 0 : i32
    %c0_i32_0 = arith.constant 0 : i32
    %c0_i32_1 = arith.constant 0 : i32
    return %arg0, %c0_i32, %c0_i32_0 : i32, i32, i32
  }
  func.func @transform_1(%arg0: i32) -> (i32, i32) {
    %c0_i32 = arith.constant 0 : i32
    %c0_i32_0 = arith.constant 0 : i32
    %c0_i32_1 = arith.constant 0 : i32
    return %c0_i32, %c0_i32_0 : i32, i32
  }
  func.func @transform_2(%arg0: i32) -> (i32, i32) {
    %c0_i32 = arith.constant 0 : i32
    %c0_i32_0 = arith.constant 0 : i32
    %c0_i32_1 = arith.constant 0 : i32
    return %c0_i32, %c0_i32_0 : i32, i32
  }
  func.func @transform_3(%arg0: i32) -> (i32, i32) {
    %c0_i32 = arith.constant 0 : i32
    %c0_i32_0 = arith.constant 0 : i32
    %c0_i32_1 = arith.constant 0 : i32
    return %c0_i32, %c0_i32_0 : i32, i32
  }
  func.func @transform_4(%arg0: i32) -> (i32, i32) {
    %c0_i32 = arith.constant 0 : i32
    %c0_i32_0 = arith.constant 0 : i32
    %c0_i32_1 = arith.constant 0 : i32
    return %c0_i32, %c0_i32_0 : i32, i32
  }
  func.func @transform_5(%arg0: i32) -> (i32, i32) {
    %c0_i32 = arith.constant 0 : i32
    %c0_i32_0 = arith.constant 0 : i32
    %c0_i32_1 = arith.constant 0 : i32
    return %c0_i32, %c0_i32_0 : i32, i32
  }
  func.func @transform_6(%arg0: i32) -> (i32, i32) {
    %c0_i32 = arith.constant 0 : i32
    %c0_i32_0 = arith.constant 0 : i32
    %c0_i32_1 = arith.constant 0 : i32
    return %c0_i32, %c0_i32_0 : i32, i32
  }
  func.func @transform_7(%arg0: i32) -> (i32, i32) {
    %c0_i32 = arith.constant 0 : i32
    %c0_i32_0 = arith.constant 0 : i32
    %c0_i32_1 = arith.constant 0 : i32
    return %c0_i32, %c0_i32_0 : i32, i32
  }
  func.func @transform_8(%arg0: i32) -> (i32, i32) {
    %c0_i32 = arith.constant 0 : i32
    %c0_i32_0 = arith.constant 0 : i32
    %c0_i32_1 = arith.constant 0 : i32
    return %c0_i32, %c0_i32_0 : i32, i32
  }
  func.func @transform_9(%arg0: i32) -> (i32, i32) {
    %c0_i32 = arith.constant 0 : i32
    %c0_i32_0 = arith.constant 0 : i32
    %c0_i32_1 = arith.constant 0 : i32
    return %c0_i32, %c0_i32_0 : i32, i32
  }
  func.func @transform_10(%arg0: i32) -> (i32, i32) {
    %c0_i32 = arith.constant 0 : i32
    %c0_i32_0 = arith.constant 0 : i32
    %c0_i32_1 = arith.constant 0 : i32
    return %c0_i32, %c0_i32_0 : i32, i32
  }
  func.func @transform_11(%arg0: i32) -> (i32, i32, i32) {
    %c0_i32 = arith.constant 0 : i32
    %c0_i32_0 = arith.constant 0 : i32
    %c0_i32_1 = arith.constant 0 : i32
    return %arg0, %c0_i32, %c0_i32_0 : i32, i32, i32
  }
}

module attributes {stable_mosaic.version = 11 : i64} {
  func.func @_attention_kernel(%arg0: i32, %arg1: i32, %arg2: memref<1x8x16xf32, #tpu.memory_space<vmem>>, %arg3: memref<1x8x16xf32, #tpu.memory_space<vmem>>, %arg4: memref<1x1x8xf32, #tpu.memory_space<vmem>>, %arg5: memref<1x8x8xbf16, #tpu.memory_space<vmem>>, %arg6: memref<1x8x8xi8, #tpu.memory_space<vmem>>, %arg7: memref<1x8x8xf32, #tpu.memory_space<vmem>>) attributes {dimension_semantics = [#tpu.dimension_semantics<parallel>, #tpu.dimension_semantics<parallel>], iteration_bounds = array<i64: 2, 1>, scalar_prefetch = 0 : i64, scratch_operands = 0 : i64, tpu.core_type = #tpu.core_type<tc>, window_params = [{transform_indices = @transform_0, window_bounds = array<i64: 1, 8, 16>}, {transform_indices = @transform_1, window_bounds = array<i64: 1, 8, 16>}, {transform_indices = @transform_2, window_bounds = array<i64: 1, 1, 8>}, {transform_indices = @transform_3, window_bounds = array<i64: 1, 8, 8>}, {transform_indices = @transform_4, window_bounds = array<i64: 1, 8, 8>}, {transform_indices = @transform_5, window_bounds = array<i64: 1, 8, 8>}]} {
    %c0 = arith.constant 0 : index
    %c0_0 = arith.constant 0 : index
    %c0_1 = arith.constant 0 : index
    %0 = vector.load %arg2[%c0, %c0_0, %c0_1] : memref<1x8x16xf32, #tpu.memory_space<vmem>>, vector<1x8x16xf32>
    %1 = vector.shape_cast %0 : vector<1x8x16xf32> to vector<8x16xf32>
    %c0_2 = arith.constant 0 : index
    %c0_3 = arith.constant 0 : index
    %c0_4 = arith.constant 0 : index
    %2 = vector.load %arg3[%c0_2, %c0_3, %c0_4] : memref<1x8x16xf32, #tpu.memory_space<vmem>>, vector<1x8x16xf32>
    %3 = vector.shape_cast %2 : vector<1x8x16xf32> to vector<8x16xf32>
    %4 = arith.mulf %1, %1 : vector<8x16xf32>
    %cst = arith.constant dense<0.000000e+00> : vector<8xf32>
    %5 = vector.multi_reduction <add>, %4, %cst [1] : vector<8x16xf32> to vector<8xf32>
    %6 = vector.shape_cast %5 : vector<8xf32> to vector<8x1xf32>
    %c0_5 = arith.constant 0 : index
    %c0_6 = arith.constant 0 : index
    %c0_7 = arith.constant 0 : index
    %7 = vector.load %arg4[%c0_5, %c0_6, %c0_7] : memref<1x1x8xf32, #tpu.memory_space<vmem>>, vector<1x1x8xf32>
    %8 = vector.shape_cast %7 : vector<1x1x8xf32> to vector<1x8xf32>
    %9 = tpu.transpose %3, [1, 0] : vector<8x16xf32> -> vector<16x8xf32>
    %cst_8 = arith.constant dense<0.000000e+00> : vector<8x8xf32>
    %10 = tpu.matmul %1, %9, %cst_8 {dimension_numbers = #tpu.dot_dimension_numbers<[1], [0], [0], [1], [0, 0, 1, 1], [], []>} : vector<8x16xf32>, vector<16x8xf32>, vector<8x8xf32> -> vector<8x8xf32>
    %11 = vector.broadcast %6 : vector<8x1xf32> to vector<8x8xf32>
    %12 = vector.broadcast %8 : vector<1x8xf32> to vector<8x8xf32>
    %13 = arith.addf %11, %12 : vector<8x8xf32>
    %cst_9 = arith.constant 2.000000e+00 : f32
    %14 = vector.broadcast %cst_9 : f32 to vector<8x8xf32>
    %15 = arith.mulf %14, %10 : vector<8x8xf32>
    %16 = arith.subf %13, %15 : vector<8x8xf32>
    %cst_10 = arith.constant -5.000000e-04 : f32
    %17 = vector.broadcast %cst_10 : f32 to vector<8x8xf32>
    %18 = arith.mulf %17, %16 : vector<8x8xf32>
    %cst_11 = arith.constant dense<0xFF800000> : vector<8xf32>
    %19 = vector.multi_reduction <maximumf>, %18, %cst_11 [1] : vector<8x8xf32> to vector<8xf32>
    %20 = vector.shape_cast %19 : vector<8xf32> to vector<8x1xf32>
    %21 = vector.broadcast %20 : vector<8x1xf32> to vector<8x8xf32>
    %22 = arith.subf %18, %21 : vector<8x8xf32>
    %23 = math.exp %22 : vector<8x8xf32>
    %cst_12 = arith.constant dense<0.000000e+00> : vector<8xf32>
    %24 = vector.multi_reduction <add>, %23, %cst_12 [1] : vector<8x8xf32> to vector<8xf32>
    %25 = vector.shape_cast %24 : vector<8xf32> to vector<8x1xf32>
    %26 = math.log %25 : vector<8x1xf32>
    %27 = arith.addf %20, %26 : vector<8x1xf32>
    %28 = vector.broadcast %27 : vector<8x1xf32> to vector<8x8xf32>
    %29 = arith.subf %18, %28 : vector<8x8xf32>
    %c0_13 = arith.constant 0 : index
    %c0_14 = arith.constant 0 : index
    %c0_15 = arith.constant 0 : index
    %30 = vector.load %arg5[%c0_13, %c0_14, %c0_15] : memref<1x8x8xbf16, #tpu.memory_space<vmem>>, vector<1x8x8xbf16>
    %31 = vector.shape_cast %30 : vector<1x8x8xbf16> to vector<8x8xbf16>
    %32 = arith.extf %31 : vector<8x8xbf16> to vector<8x8xf32>
    %33 = arith.addf %29, %32 : vector<8x8xf32>
    %c0_16 = arith.constant 0 : index
    %c0_17 = arith.constant 0 : index
    %c0_18 = arith.constant 0 : index
    %34 = vector.load %arg6[%c0_16, %c0_17, %c0_18] : memref<1x8x8xi8, #tpu.memory_space<vmem>>, vector<1x8x8xi8>
    %35 = vector.shape_cast %34 : vector<1x8x8xi8> to vector<8x8xi8>
    %c0_i8 = arith.constant 0 : i8
    %36 = vector.broadcast %c0_i8 : i8 to vector<8x8xi8>
    %37 = arith.cmpi ne, %35, %36 : vector<8x8xi8>
    %cst_19 = arith.constant 0xFF800000 : f32
    %38 = vector.broadcast %cst_19 : f32 to vector<8x8xf32>
    %39 = arith.select %37, %33, %38 : vector<8x8xi1>, vector<8x8xf32>
    %c0_20 = arith.constant 0 : index
    %c0_21 = arith.constant 0 : index
    %c0_22 = arith.constant 0 : index
    %40 = vector.load %arg7[%c0_20, %c0_21, %c0_22] : memref<1x8x8xf32, #tpu.memory_space<vmem>>, vector<1x8x8xf32>
    %41 = vector.shape_cast %40 : vector<1x8x8xf32> to vector<8x8xf32>
    %42 = vector.shape_cast %39 : vector<8x8xf32> to vector<1x8x8xf32>
    tpu.vector_store %arg7[%c0_20, %c0_21, %c0_22], %42 {strides = array<i32>} : memref<1x8x8xf32, #tpu.memory_space<vmem>>, vector<1x8x8xf32>,
    return
  }
  func.func @transform_0(%arg0: i32, %arg1: i32) -> (i32, i32, i32) {
    %c0_i32 = arith.constant 0 : i32
    %c0_i32_0 = arith.constant 0 : i32
    return %arg0, %arg1, %c0_i32 : i32, i32, i32
  }
  func.func @transform_1(%arg0: i32, %arg1: i32) -> (i32, i32, i32) {
    %c0_i32 = arith.constant 0 : i32
    %c0_i32_0 = arith.constant 0 : i32
    %c0_i32_1 = arith.constant 0 : i32
    return %arg0, %c0_i32, %c0_i32_0 : i32, i32, i32
  }
  func.func @transform_2(%arg0: i32, %arg1: i32) -> (i32, i32, i32) {
    %c0_i32 = arith.constant 0 : i32
    %c0_i32_0 = arith.constant 0 : i32
    %c0_i32_1 = arith.constant 0 : i32
    return %arg0, %c0_i32, %c0_i32_0 : i32, i32, i32
  }
  func.func @transform_3(%arg0: i32, %arg1: i32) -> (i32, i32, i32) {
    %c0_i32 = arith.constant 0 : i32
    %c0_i32_0 = arith.constant 0 : i32
    return %arg0, %arg1, %c0_i32 : i32, i32, i32
  }
  func.func @transform_4(%arg0: i32, %arg1: i32) -> (i32, i32, i32) {
    %c0_i32 = arith.constant 0 : i32
    %c0_i32_0 = arith.constant 0 : i32
    return %arg0, %arg1, %c0_i32 : i32, i32, i32
  }
  func.func @transform_5(%arg0: i32, %arg1: i32) -> (i32, i32, i32) {
    %c0_i32 = arith.constant 0 : i32
    %c0_i32_0 = arith.constant 0 : i32
    return %arg0, %arg1, %c0_i32 : i32, i32, i32
  }
}

</mosaic_0001>

<bundles_post_ra>
// kernel: model_forward.5
= control target key start
LH: loop header
LB: loop body
LE: loop exit
PB: predicated region body
PF: predicated region fallthrough
CT: control target
= control target key end

     0   :  { %10 = vsyncpa [#allocation3], 0  ;;  %s922_s0 = inlined_call_operand.vmem [shape: f32[2,8,16], index: 0, kind: input, shape index: {}]   ;;  %s923_s1 = inlined_call_operand.vmem [shape: f32[2,8,16], index: 1, kind: input, shape index: {}]   ;;  %s924_s2 = inlined_call_operand.vmem [shape: f32[2,1,8], index: 2, kind: input, shape index: {}]   ;;  %s925_s3 = inlined_call_operand.vmem [shape: bf16[2,8,8], index: 3, kind: input, shape index: {}]   ;;  %s926_s4 = inlined_call_operand.vmem [shape: s8[2,8,8], index: 4, kind: input, shape index: {}]   ;;  %s927_s5 = inlined_call_operand.hbm [shape: f32[2,8,8], index: 5, kind: output, shape index: {}]  }
   0x1   :  { %12 = vsyncpa [#allocation3 + $0x1], 0  ;;  %s789_s18 = smov 0   ;;  %s791_s19 = smov 0  }
   0x2   :  { %s793_s20 = smov 0   ;;  %s795_s21 = smov 0  }
   0x3   :  { %s797_s22 = smov 0   ;;  %s799_s23 = smov 0  }
   0x4 LB: > { %s589_s24 = sadd.s32 4294967295, %s753_s23   ;;  %s590_s25 = sadd.s32 4294967294, %s753_s23   ;;  %s753_s23 = sphi %s799_s23, %s18_s23   ;;  %s749_s22 = sphi %s797_s22, %s934_s22   ;;  %s745_s21 = sphi %s795_s21, %s933_s21   ;;  %s741_s20 = sphi %s793_s20, %s932_s20   ;;  %s737_s19 = sphi %s791_s19, %s931_s19   ;;  %s733_s18 = sphi %s789_s18, %s930_s18  }
   0x5   : > { %s30_s26 = sadd.s32 1, %s749_s22  ;;  %s175_s27 = sadd.s32 1, %s741_s20 }
   0x6   : > { %p32_p0 = scmp.ge.s32.totalorder %s30_s26, 2  ;;  %p185_p1 = scmp.ne.s32.totalorder %s741_s20, %s737_s19 }
   0x7   : > { %p186_p2 = scmp.eq.s32.totalorder %s589_s24, 1  ;;  %p191_p3 = scmp.ne.s32.totalorder %s737_s19, %s733_s18 }
   0x8   : > { %s936_s26 = smov (%p32_p0, %s30_s26), 0  ;;  %p192_p5 = scmp.eq.s32.totalorder %s590_s25, 1 }
   0x9   : > { %p829_p4 = por %p186_p2, %p185_p1  ;;  %s170_s29 = ssub.s32 %s749_s22, %s936_s26 }
   0xa   : > { %p593_p6 = scmp.ge.s32.totalorder %s753_s23, 1  ;;  %p173_p7 = scmp.eq.s32.totalorder %s170_s29, 0 }
   0xb   : > { %p836_p8 = por %p192_p5, %p191_p3  ;;  %p253_p9 = scmp.lt.s32.totalorder %s753_s23, 3 }
   0xc   : > { %s842_s6 = scalar_select %p173_p7, %s741_s20, %s175_s27  }
   0xd   : > { %p254_p10 = pnand %p593_p6, %p253_p9 }
   0xe   : > { %p304_p11 = scmp.lt.s32.totalorder (!%p254_p10), %s745_s21, 1  ;;  %v755_v0 = vmov (!%p254_p10), 0.0   ;;  %vm756_vm0 = vmmov (!%p254_p10), 0   ;;  %vm337_vm1 = vcmask (!%p254_p10), 130048   ;;  %vm428_vm2 = vcmask (!%p254_p10), 64512   ;;  %s301_s9 = sand.u32 (!%p254_p10), 1, %s737_s19  }
   0xf   : > { %257 = sbr.rel (%p254_p10) target bundleno = 583 (0x247), region = 40  ;;  %608 = vmatprep.subr.mxu0 (!%p254_p10), %v755_v0  ;;  %610 = vmatprep.mubr.msk.f32.mxu0 (!%p254_p10), %vm756_vm0, %v755_v0  ;;  %s594_s13 = sshll.u32 (!%p254_p10), %s301_s9, 3  ;;  %v757_v21 = vmov (!%p254_p10), 0  }
  0x10   : > { %s303_s15 = scalar_lea.vmem (!%p254_p10), [#allocation2], %s594_s13  ;;  %s453_s25 = scalar_lea.sflag (!%p254_p10), [#allocation3], %s301_s9 }
  0x16   : > { %s846_s7 = scalar_select %p304_p11, %s745_s21, 1 }
  0x18   : > { %s595_s8 = sshll.u32 %s846_s7, 3  ;;  %s317_s17 = scalar_lea.vmem %s924_s2, %s846_s7 }
  0x19   : > { %s314_s11 = scalar_lea.vmem %s923_s1, %s595_s8  ;;  %s310_s14 = scalar_lea.vmem %s922_s0, %s595_s8  ;;  %v601_v5 = vld [vmem:[%s317_s17] ss:$0 sm:$0xff] }
  0x1a   : > { %v335_v1 = vld [vmem:[%s314_s11] sm:$0xff]  ;;  %s598_s24 = sshll.u32 %s846_s7, 1  ;;  %s597_s8 = sshll.u32 %s846_s7, 2 }
  0x1b   : > { %v334_v2 = vld [vmem:[%s310_s14] sm:$0xff]  ;;  %609 = vmatpush3.xpose.msk.msra.mxu0 %vm337_vm1, %v335_v1  ;;  %s331_s29 = scalar_lea.vmem %s926_s4, %s598_s24  ;;  %s324_s12 = scalar_lea.vmem %s925_s3, %s597_s8 }
  0x1c   : > { %v336_v3 = vmul.f32 %v334_v2, %v334_v2  ;;  %v445_v20 = vld [vmem:[%s331_s29] sm:$0x3]  ;;  %s603_s14 = sshll.u32 %s745_s21, 7  ;;  %s467_s7 = sshll.u32 %s303_s15, 4  ;;  %s876_s7 = int_to_ptr.vmem [resolvable:$true] %s467_s7 }
  0x1d   : > { %vm446_vm3 = vnez %v445_v20  ;;  %v442_v24 = vld [vmem:[%s324_s12] sm:$0xf]  ;;  %s874_s24 = scalar_lea.hbm %s927_s5, %s603_s14  ;;  %s675_s27 = scalar_lea.vmem %s876_s7, 128 }
  0x1e   : > { %v338_v4 = vsel %vm337_vm1, %v336_v3, 0.0  ;;  %611 = vmatmul.mubr.msk.f32.vlgmr.msra.gmra.mrb[0].mxu0 %vm337_vm1, %v334_v2  ;;  %v447_v22 = vsel %vm446_vm3, 16843009, %v757_v21  ;;  %v443_v28 = vunpack.c.l.bf16 %v442_v24  ;;  %p676_p12 = scmp.ne.s32.totalorder %s876_s7, %s675_s27  ;;  %s758_s21 = smov [#allocation2]  }
  0x1f   : > { %339 = vadd.xlane.f32.xlu0 %v338_v4  ;;  %v448_v26 = vunpack.c.0.s8 %v447_v22  ;;  %s679_s29 = sshll.u32 %s758_s21, 4  ;;  %s680_s29 = int_to_ptr.vmem [resolvable:$false] %s679_s29 }
  0x20   : > { %p677_p13 = pnand %p676_p12, %p829_p4  ;;  %s681_s8 = scalar_lea.vmem %s680_s29, 256 }
  0x21   : > { %vm449_vm4 = vcmp.ne.s32.totalorder %v448_v26, 0  ;;  %p682_p1 = scmp.lt.s32.totalorder %s876_s7, %s680_s29  ;;  %p683_p2 = scmp.lt.s32.totalorder %s681_s8, %s675_s27 }
  0x22   : > { %p678_p0 = pneg %p677_p13 }
  0x23   : > { %p684_p3 = por %p683_p2, %p682_p1 }
  0x25   : > { %p685_p5 = pnand %p684_p3, %p678_p0 }
  0xac   : > { %v340_v6 = vpop.xlane.xlu0 %339 }
  0xad   : > { %v424_v7 = vadd.f32 %v601_v5, %v340_v6 }
  0xf1   : > { %v414_v8 = vpop.f32.mrb[0].mxu0 }
  0xf2   : > { %v425_v9 = vmul.f32 2.0, %v414_v8  ;;  %v612_v10 = vpop.f32.mrb[1].mxu0 }
  0xf4   : > { %v426_v11 = vsub.f32 %v424_v7, %v425_v9 }
  0xf6   : > { %v427_v12 = vmul.f32 -0.0005, %v426_v11 }
  0xf8   : > { %v429_v13 = vsel %vm428_vm2, %v427_v12, -inf }
  0xf9   : > { %430 = vmax.xlane.f32.xlu0 %v429_v13 }
 0x186   : > { %v431_v14 = vpop.xlane.xlu0 %430 }
 0x187   : > { %v432_v15 = vsub.f32 %v427_v12, %v431_v14 }
 0x189   : > { %v433_v16 = vmul.f32 1.442695, %v432_v15 }
 0x18b   : > { %671 = vpow2.f32 %v433_v16 }
 0x195   : > { %v672_v17 = vpop.eup %671 }
 0x196   : > { %v435_v18 = vsel %vm428_vm2, %v672_v17, 0.0 }
 0x197   : > { %436 = vadd.xlane.f32.xlu1 %v435_v18 }
 0x224   : > { %v437_v19 = vpop.xlane.xlu1 %436 }
 0x225   : > { %673 = vlog2.f32 %v437_v19 }
 0x22f   : > { %v674_v23 = vpop.eup %673 }
 0x230   : > { %v439_v25 = vmul.f32 0.6931472, %v674_v23 }
 0x232   : > { %v440_v27 = vadd.f32 %v439_v25, %v431_v14 }
 0x234   : > { %v441_v29 = vsub.f32 %v427_v12, %v440_v27 }
 0x236   : > { %v444_v30 = vadd.f32 %v443_v28, %v441_v29 }
 0x238   : > { %v450_v31 = vsel %vm449_vm4, %v444_v30, -inf }
 0x239   : > { %451 = vst.msk [vmem:[%s303_s15] sm:$0xff] %vm428_vm2, %v450_v31 }
 0x23a   : > { %688 = shalt.err (!%p685_p5)
}
 0x23b   : > { %s689_s9 = scalar_lea.hbm %s874_s24, 128  ;;  %s693_s12 = scalar_lea.hbm %s927_s5, 256 }
 0x23c   : > { %p690_p6 = scmp.ne.s32.totalorder %s874_s24, %s689_s9  ;;  %p694_p10 = scmp.lt.u32.totalorder %s874_s24, %s927_s5 }
 0x23d   : > { %p695_p11 = scmp.lt.u32.totalorder %s693_s12, %s689_s9  ;;  %p697_p13 = scmp.lt.u32.totalorder %s689_s9, %s874_s24 }
 0x23e   : > { %p691_p7 = pnand %p690_p6, %p829_p4 }
 0x23f   : > { %p696_p12 = por %p695_p11, %p694_p10 }
 0x240   : > { %p692_p9 = pneg %p691_p7 }
 0x241   : > { %p698_p0 = por %p697_p13, %p696_p12 }
 0x243   : > { %p699_p1 = pnand %p698_p0, %p692_p9 }
 0x245   : > { %702 = shalt.err (!%p699_p1)
}
 0x246   : > { %613 = dma.vmem_to_hbm [thread:$0]  (%p829_p4), %s876_s7, 128, %s874_s24, %s453_s25  }
 0x247 PF: > { %p619_p2 = scmp.ge.s32.totalorder %s753_s23, 2  ;;  %s479_s15 = sand.u32 1, %s733_s18  }
 0x248   : > { %s480_s16 = scalar_lea.sflag [#allocation3], %s479_s15 }
 0x249   : > { %p616_p3 = pnand %p619_p2, %p836_p8 }
 0x24b   : > { %728 = dma.done.wait (!%p616_p3), %s480_s16, 128  }
 0x24c   : > { %730 = vsyncadd (!%p616_p3), %s480_s16, 4294967168  ;;  %s18_s23 = sadd.s32 1, %s753_s23   ;;  %s930_s18 = smov %s737_s19 }
 0x24d   : > { %p15_p5 = scmp.ge.s32.totalorder %s18_s23, 4   ;;  %s931_s19 = smov %s741_s20 }
 0x24e   : > { %s932_s20 = smov %s842_s6  ;;  %s933_s21 = smov %s749_s22 }
 0x24f   : > { %s934_s22 = smov %s936_s26  ;;  %17 = sbr.rel (!%p15_p5) target bundleno = 4 (0x4), region = 87 }
 0x256   :  { %485 = vsyncpa [#allocation3], 1 }
 0x257   :  { %487 = vsyncpa [#allocation3 + $0x1], 1 }

// kernel: model_forward.3
= control target key start
LH: loop header
LB: loop body
LE: loop exit
PB: predicated region body
PF: predicated region fallthrough
CT: control target
= control target key end

     0   :  { %s1200_s24 = smov 0   ;;  %s1346_s0 = inlined_call_operand.vmem [shape: f32[2,16,128], index: 0, kind: input, shape index: {}]   ;;  %s1347_s1 = inlined_call_operand.vmem [shape: f32[32,48], index: 1, kind: input, shape index: {}]   ;;  %s1348_s2 = inlined_call_operand.vmem [shape: f32[32,1], index: 2, kind: input, shape index: {}]   ;;  %s1349_s3 = inlined_call_operand.vmem [shape: f32[16,96], index: 3, kind: input, shape index: {}]   ;;  %s1350_s4 = inlined_call_operand.vmem [shape: f32[16,1], index: 4, kind: input, shape index: {}]   ;;  %s1351_s5 = inlined_call_operand.vmem [shape: f32[16,16], index: 5, kind: input, shape index: {}]   ;;  %s1352_s6 = inlined_call_operand.vmem [shape: f32[16,1], index: 6, kind: input, shape index: {}]   ;;  %s1353_s7 = inlined_call_operand.vmem [shape: f32[2,16,128], index: 7, kind: output, shape index: {}]  }
   0x1 LB: > { %s867_s25 = sadd.s32 4294967295, %s1153_s24   ;;  %p871_p0 = scmp.ge.s32.totalorder %s1153_s24, 1  ;;  %s1153_s24 = sphi %s1200_s24, %s17_s24  }
   0x2   : > { %p237_p1 = scmp.lt.s32.totalorder %s1153_s24, 3 }
   0x4   : > { %p238_p2 = pnand %p871_p0, %p237_p1 }
   0x5   : > { %p269_p3 = scmp.lt.s32.totalorder (!%p238_p2), %s867_s25, 1  ;;  %v1155_v3 = vmov (!%p238_p2), 0.0   ;;  %s1156_s30 = smov (!%p238_p2), 127   ;;  %vm321_vm0 = vcmask (!%p238_p2), 1031168   ;;  %v291_v13 = vld [vmem:[%s1347_s1] sm:$0xff] (!%p238_p2)  ;;  %vm377_vm1 = vcmask (!%p238_p2), 392192   ;;  %v479_v50 = vlaneseq (!%p238_p2) }
   0x6   : > { %241 = sbr.rel (%p238_p2) target bundleno = 1182 (0x49e), region = 48  ;;  %s1157_s8 = smov (!%p238_p2), 126   ;;  %930 = vmatprep.mubr.msk.f32.mxu0 (!%p238_p2), %vm377_vm1, %v291_v13  ;;  %vm366_vm2 = vcmask (!%p238_p2), 7168   ;;  %v296_v27 = vld [vmem:[%s1348_s2 + $0x8] sm:$0xff] (!%p238_p2)  ;;  %v1159_v29 = vmov (!%p238_p2), 0   ;;  %v295_v30 = vld [vmem:[%s1348_s2] sm:$0xff] (!%p238_p2) }
   0x7   : > { %s1158_s9 = smov (!%p238_p2), 1   ;;  %1066 = vset.pattern.permute.xlu1 (!%p238_p2), %v1159_v29  ;;  %1065 = vset.pattern.permute.xlu0 (!%p238_p2), %v1159_v29  ;;  %v297_v32 = vld [vmem:[%s1348_s2 + $0x10] sm:$0xff] (!%p238_p2)  ;;  %v298_v33 = vld [vmem:[%s1348_s2 + $0x18] sm:$0xff] (!%p238_p2)  ;;  %v292_v47 = vld [vmem:[%s1347_s1 + $0x8] sm:$0xff] (!%p238_p2)  ;;  %v1262_v52 = vand.u32 (!%p238_p2), 127, %v479_v50  ;;  %vm624_vm4 = vcmask (!%p238_p2), 785408  }
   0x8   : > { %v293_v48 = vld [vmem:[%s1347_s1 + $0x10] sm:$0xff] (!%p238_p2)  ;;  %v294_v49 = vld [vmem:[%s1347_s1 + $0x18] sm:$0xff] (!%p238_p2)  ;;  %vm728_vm5 = vcmask (!%p238_p2), 130048  }
   0x9   : > { %vm481_vm3 = vcmp.lt.s32.totalorder (!%p238_p2), %v1262_v52, 8 }
   0xa   : > { %vm1007_vm6 = vmpackc.low (!%p238_p2), %vm481_vm3, %vm481_vm3 }
   0xd   : > { %s1355_s25 = smov (!%p269_p3, %s867_s25), 1 }
   0xe   : > { %s886_s26 = sshll.u32 %s1355_s25, 4 }
   0xf   : > { %s273_s29 = scalar_lea.vmem %s1346_s0, %s886_s26  ;;  %s278_s27 = scalar_lea.vmem %s1353_s7, %s886_s26 }
  0x10   : > { %v287_v0 = vld [vmem:[%s273_s29] sm:$0xff]  ;;  %v288_v1 = vld [vmem:[%s273_s29 + $0x8] sm:$0xff] }
  0x11   : > { %v1025_v2 = vpack.i.bf16 %v288_v1, %v287_v0  ;;  %v1035_v4 = vpack.i.bf16 %v1155_v3, %v288_v1  ;;  %v1030_v5 = vpack.i.bf16 %v1155_v3, %v287_v0  ;;  %v1040_v6 = vpack.i.bf16 %v287_v0, %v1155_v3 }
  0x12   : > { %v1045_v7 = vpack.i.bf16 %v288_v1, %v1155_v3 }
  0x13   : > { %1026 = vrot.lane.b32.xlu0 %v1025_v2, %s1156_s30  ;;  %1036 = vrot.lane.b32.xlu1 %v1035_v4, %s1157_s8 }
  0x17   : > { %1031 = vrot.lane.b32.xlu0 %v1030_v5, %s1157_s8  ;;  %1041 = vrot.lane.b32.xlu1 %v1040_v6, %s1158_s9 }
  0x1b   : > { %1046 = vrot.lane.b32.xlu0 %v1045_v7, %s1158_s9 }
  0x85   : > { %v1027_v8 = vpop.permute.xlu0 %1026  ;;  %v1037_v9 = vpop.permute.xlu1 %1036 }
  0x86   : > { %v1039_v10 = vunpack.i.h.bf16 %v1037_v9  ;;  %v1038_v11 = vunpack.i.l.bf16 %v1037_v9  ;;  %1051 = vrot.lane.b32.xlu1 %v1027_v8, %s1158_s9 }
  0x88   : > { %v323_v12 = vsel %vm321_vm0, %v1038_v11, %v1039_v10 }
  0x89   : > { %v1060_v14 = vpack.i.bf16 %v323_v12, %v1038_v11  ;;  %v1032_v15 = vpop.permute.xlu0 %1031  ;;  %v1042_v16 = vpop.permute.xlu1 %1041 }
  0x8a   : > { %v1034_v17 = vunpack.i.h.bf16 %v1032_v15  ;;  %v1033_v18 = vunpack.i.l.bf16 %v1032_v15  ;;  %v1044_v19 = vunpack.i.h.bf16 %v1042_v16  ;;  %v1043_v20 = vunpack.i.l.bf16 %v1042_v16 }
  0x8b   : > { %1061 = vrot.lane.b32.xlu1 %v1060_v14, %s1158_s9 }
  0x8c   : > { %v322_v21 = vsel %vm321_vm0, %v1033_v18, %v1034_v17  ;;  %v367_v26 = vsel %vm366_vm2, %v1043_v20, %v1044_v19 }
  0x8d   : > { %v1055_v22 = vpack.i.bf16 %v322_v21, %v1033_v18  ;;  %v1047_v23 = vpop.permute.xlu0 %1046 }
  0x8e   : > { %v1049_v24 = vunpack.i.h.bf16 %v1047_v23  ;;  %v1048_v25 = vunpack.i.l.bf16 %v1047_v23 }
  0x8f   : > { %1056 = vrot.lane.b32.xlu0 %v1055_v22, %s1158_s9  ;;  %331 = vperm.xlu1 %1066, %v296_v27  }
  0x90   : > { %v368_v28 = vsel %vm366_vm2, %v1048_v25, %v1049_v24 }
  0x91   : > { %v970_v31 = vpack.c.bf16 %v368_v28, %v367_v26 }
  0x93   : > { %971 = vmatprep.subr.bf16.mxu0 %v970_v31  ;;  %326 = vperm.xlu0 %1065, %v295_v30  }
  0x94   : > { %973 = vmatpush3.bf16.msra.mxu0 %v970_v31  ;;  %336 = vperm.xlu1 %1066, %v297_v32  }
  0x97   : > { %341 = vperm.xlu0 %1065, %v298_v33   ;;  %v490_v33 = vld [vmem:[%s1349_s3] sm:$0xff] }
  0x98   : > { %960 = vmatprep.mubr.msk.f32.mxu1 %vm624_vm4, %v490_v33 }
  0xf8   : > { %v1052_v34 = vpop.permute.xlu1 %1051 }
  0xf9   : > { %v1054_v35 = vunpack.i.h.bf16 %v1052_v34  ;;  %v1053_v36 = vunpack.i.l.bf16 %v1052_v34 }
  0xfb   : > { %v974_v37 = vpack.c.bf16 %v1054_v35, %v1053_v36 }
  0xfd   : > { %v1062_v38 = vpop.permute.xlu1 %1061  ;;  %975 = vmatprep.subr.bf16.mxu0 %v974_v37 }
  0xfe   : > { %v1064_v39 = vunpack.i.h.bf16 %v1062_v38  ;;  %v1063_v40 = vunpack.i.l.bf16 %v1062_v38  ;;  %977 = vmatpush3.bf16.msra.mxu0 %v974_v37 }
 0x100   : > { %v370_v44 = vsel %vm366_vm2, %v1063_v40, %v1064_v39 }
 0x101   : > { %v1057_v41 = vpop.permute.xlu0 %1056 }
 0x102   : > { %v1059_v42 = vunpack.i.h.bf16 %v1057_v41  ;;  %v1058_v43 = vunpack.i.l.bf16 %v1057_v41 }
 0x104   : > { %v369_v45 = vsel %vm366_vm2, %v1058_v43, %v1059_v42  ;;  %v492_v43 = vld [vmem:[%s1350_s4] sm:$0xff] }
 0x105   : > { %v978_v46 = vpack.c.bf16 %v370_v44, %v369_v45 }
 0x107   : > { %979 = vmatprep.subr.bf16.mxu0 %v978_v46 }
 0x108   : > { %981 = vmatpush3.bf16.msra.mxu0 %v978_v46 }
 0x10b   : > { %931 = vmatmul.mubr.msk.f32.vlgmr.msra.gmra.mrb[0].mxu0 %vm377_vm1, %v292_v47 }
 0x10c   : > { %933 = vmatprep.mubr.msk.f32.mxu0 %vm377_vm1, %v293_v48 }
 0x10e   : > { %v332_v53 = vpop.permute.xlu1 %331 }
 0x10f   : > { %934 = vmatmul.mubr.msk.f32.gmra.mrb[2].mxu0 %vm377_vm1, %v294_v49 }
 0x112   : > { %v327_v51 = vpop.permute.xlu0 %326 }
 0x113   : > { %v337_v63 = vpop.permute.xlu1 %336 }
 0x116   : > { %v342_v59 = vpop.permute.xlu0 %341 }
 0x1de   : > { %v932_v54 = vpop.f32.mrb[0].mxu0 }
 0x1df   : > { %v462_v55 = vadd.f32 %v932_v54, %v332_v53  ;;  %v456_v56 = vpop.f32.mrb[1].mxu0 }
 0x1e0   : > { %v457_v57 = vadd.f32 %v456_v56, %v327_v51  ;;  %v493_v51 = vld [vmem:[%s1350_s4 + $0x8] sm:$0xff] }
 0x1e1   : > { %v476_v58 = vmax.f32 %v462_v55, 0.0 }
 0x1e2   : > { %v475_v60 = vmax.f32 %v457_v57, 0.0  ;;  %v935_v61 = vpop.f32.mrb[2].mxu0  ;;  %v714_v57 = vld [vmem:[%s1352_s6] sm:$0xff] }
 0x1e3   : > { %v483_v62 = vsel %vm481_vm3, %v476_v58, 0.0  ;;  %v472_v0 = vadd.f32 %v935_v61, %v342_v59  ;;  %v466_v1 = vpop.f32.mrb[3].mxu0 }
 0x1e4   : > { %v482_v2 = vsel %vm481_vm3, %v475_v60, 0.0  ;;  %v467_v4 = vadd.f32 %v466_v1, %v337_v63  ;;  %v1082_v12 = vpack.i.bf16 %v1155_v3, %v483_v62  ;;  %v1102_v16 = vpack.i.bf16 %v483_v62, %v1155_v3  ;;  %v715_v60 = vld [vmem:[%s1352_s6 + $0x8] sm:$0xff] }
 0x1e5   : > { %v478_v5 = vmax.f32 %v472_v0, 0.0  ;;  %v1067_v6 = vpack.i.bf16 %v483_v62, %v482_v2  ;;  %v1072_v11 = vpack.i.bf16 %v1155_v3, %v482_v2  ;;  %v1097_v15 = vpack.i.bf16 %v482_v2, %v1155_v3 }
 0x1e6   : > { %v477_v7 = vmax.f32 %v467_v4, 0.0 }
 0x1e7   : > { %v485_v8 = vsel %vm481_vm3, %v478_v5, 0.0  ;;  %1068 = vrot.lane.b32.xlu1 %v1067_v6, %s1156_s30 }
 0x1e8   : > { %v484_v9 = vsel %vm481_vm3, %v477_v7, 0.0  ;;  %v1092_v14 = vpack.i.bf16 %v1155_v3, %v485_v8  ;;  %v1112_v18 = vpack.i.bf16 %v485_v8, %v1155_v3 }
 0x1e9   : > { %v1077_v10 = vpack.i.bf16 %v485_v8, %v484_v9  ;;  %v1087_v13 = vpack.i.bf16 %v1155_v3, %v484_v9  ;;  %v1107_v17 = vpack.i.bf16 %v484_v9, %v1155_v3 }
 0x1eb   : > { %1078 = vrot.lane.b32.xlu0 %v1077_v10, %s1156_s30  ;;  %1073 = vrot.lane.b32.xlu1 %v1072_v11, %s1157_s8 }
 0x1ef   : > { %1083 = vrot.lane.b32.xlu0 %v1082_v12, %s1157_s8  ;;  %1088 = vrot.lane.b32.xlu1 %v1087_v13, %s1157_s8 }
 0x1f3   : > { %1093 = vrot.lane.b32.xlu0 %v1092_v14, %s1157_s8  ;;  %1098 = vrot.lane.b32.xlu1 %v1097_v15, %s1158_s9 }
 0x1f7   : > { %1103 = vrot.lane.b32.xlu0 %v1102_v16, %s1158_s9  ;;  %1108 = vrot.lane.b32.xlu1 %v1107_v17, %s1158_s9 }
 0x1fb   : > { %1113 = vrot.lane.b32.xlu0 %v1112_v18, %s1158_s9 }
 0x259   : > { %v1069_v19 = vpop.permute.xlu1 %1068 }
 0x25a   : > { %1118 = vrot.lane.b32.xlu1 %v1069_v19, %s1158_s9 }
 0x25d   : > { %v1079_v20 = vpop.permute.xlu0 %1078  ;;  %v1074_v21 = vpop.permute.xlu1 %1073 }
 0x25e   : > { %v1076_v22 = vunpack.i.h.bf16 %v1074_v21  ;;  %v1075_v23 = vunpack.i.l.bf16 %v1074_v21  ;;  %1128 = vrot.lane.b32.xlu0 %v1079_v20, %s1158_s9 }
 0x260   : > { %v546_v24 = vsel %vm321_vm0, %v1075_v23, %v1076_v22 }
 0x261   : > { %v1122_v25 = vpack.i.bf16 %v546_v24, %v1075_v23  ;;  %v1084_v26 = vpop.permute.xlu0 %1083  ;;  %v1089_v27 = vpop.permute.xlu1 %1088 }
 0x262   : > { %v1086_v28 = vunpack.i.h.bf16 %v1084_v26  ;;  %v1085_v29 = vunpack.i.l.bf16 %v1084_v26  ;;  %v1091_v30 = vunpack.i.h.bf16 %v1089_v27  ;;  %v1090_v31 = vunpack.i.l.bf16 %v1089_v27  ;;  %v491_v27 = vld [vmem:[%s1349_s3 + $0x8] sm:$0xff] }
 0x263   : > { %1123 = vrot.lane.b32.xlu1 %v1122_v25, %s1158_s9 }
 0x264   : > { %v547_v3 = vsel %vm321_vm0, %v1085_v29, %v1086_v28  ;;  %v548_v32 = vsel %vm321_vm0, %v1090_v31, %v1091_v30  ;;  %v712_v28 = vld [vmem:[%s1351_s5] sm:$0xff] }
 0x265   : > { %v1132_v34 = vpack.i.bf16 %v547_v3, %v1085_v29  ;;  %v1137_v35 = vpack.i.bf16 %v548_v32, %v1090_v31  ;;  %v1094_v36 = vpop.permute.xlu0 %1093  ;;  %v1099_v37 = vpop.permute.xlu1 %1098  ;;  %967 = vmatprep.mubr.msk.f32.mxu0 %vm728_vm5, %v712_v28 }
 0x266   : > { %v1096_v38 = vunpack.i.h.bf16 %v1094_v36  ;;  %v1095_v39 = vunpack.i.l.bf16 %v1094_v36  ;;  %v1101_v41 = vunpack.i.h.bf16 %v1099_v37  ;;  %v1100_v42 = vunpack.i.l.bf16 %v1099_v37  ;;  %v713_v37 = vld [vmem:[%s1351_s5 + $0x8] sm:$0xff] }
 0x267   : > { %1133 = vrot.lane.b32.xlu0 %v1132_v34, %s1158_s9  ;;  %1138 = vrot.lane.b32.xlu1 %v1137_v35, %s1158_s9 }
 0x268   : > { %v549_v40 = vsel %vm321_vm0, %v1095_v39, %v1096_v38  ;;  %v604_v53 = vsel %vm366_vm2, %v1100_v42, %v1101_v41 }
 0x269   : > { %v1142_v44 = vpack.i.bf16 %v549_v40, %v1095_v39  ;;  %v1104_v45 = vpop.permute.xlu0 %1103  ;;  %v1109_v46 = vpop.permute.xlu1 %1108 }
 0x26a   : > { %v1106_v47 = vunpack.i.h.bf16 %v1104_v45  ;;  %v1105_v48 = vunpack.i.l.bf16 %v1104_v45  ;;  %v1111_v49 = vunpack.i.h.bf16 %v1109_v46  ;;  %v1110_v50 = vunpack.i.l.bf16 %v1109_v46 }
 0x26b   : > { %1143 = vrot.lane.b32.xlu0 %v1142_v44, %s1158_s9  ;;  %552 = vperm.xlu1 %1066, %v492_v43  }
 0x26c   : > { %v605_v54 = vsel %vm366_vm2, %v1105_v48, %v1106_v47  ;;  %v606_v61 = vsel %vm366_vm2, %v1110_v50, %v1111_v49 }
 0x26d   : > { %v1114_v55 = vpop.permute.xlu0 %1113  ;;  %v982_v56 = vpack.c.bf16 %v605_v54, %v604_v53 }
 0x26e   : > { %v1116_v58 = vunpack.i.h.bf16 %v1114_v55  ;;  %v1115_v59 = vunpack.i.l.bf16 %v1114_v55 }
 0x26f   : > { %557 = vperm.xlu0 %1065, %v493_v51   ;;  %983 = vmatprep.subr.bf16.mxu1 %v982_v56 }
 0x270   : > { %720 = vperm.xlu1 %1066, %v714_v57   ;;  %985 = vmatpush3.bf16.msra.mxu1 %v982_v56  ;;  %v607_v62 = vsel %vm366_vm2, %v1115_v59, %v1116_v58 }
 0x271   : > { %v986_v63 = vpack.c.bf16 %v607_v62, %v606_v61 }
 0x273   : > { %725 = vperm.xlu0 %1065, %v715_v60   ;;  %987 = vmatprep.subr.bf16.mxu1 %v986_v63 }
 0x274   : > { %989 = vmatpush3.bf16.msra.mxu1 %v986_v63 }
 0x2cc   : > { %v1119_v0 = vpop.permute.xlu1 %1118 }
 0x2cd   : > { %v1121_v1 = vunpack.i.h.bf16 %v1119_v0  ;;  %v1120_v2 = vunpack.i.l.bf16 %v1119_v0 }
 0x2cf   : > { %v990_v4 = vpack.c.bf16 %v1121_v1, %v1120_v2 }
 0x2d0   : > { %v1129_v5 = vpop.permute.xlu0 %1128 }
 0x2d1   : > { %v1131_v6 = vunpack.i.h.bf16 %v1129_v5  ;;  %v1130_v7 = vunpack.i.l.bf16 %v1129_v5  ;;  %991 = vmatprep.subr.bf16.mxu1 %v990_v4 }
 0x2d2   : > { %993 = vmatpush3.bf16.msra.mxu1 %v990_v4 }
 0x2d3   : > { %v994_v9 = vpack.c.bf16 %v1131_v6, %v1130_v7 }
 0x2d5   : > { %v1124_v8 = vpop.permute.xlu1 %1123  ;;  %995 = vmatprep.subr.bf16.mxu1 %v994_v9 }
 0x2d6   : > { %v1126_v10 = vunpack.i.h.bf16 %v1124_v8  ;;  %v1125_v11 = vunpack.i.l.bf16 %v1124_v8  ;;  %997 = vmatpush3.bf16.msra.mxu1 %v994_v9 }
 0x2d8   : > { %v608_v18 = vsel %vm366_vm2, %v1125_v11, %v1126_v10 }
 0x2d9   : > { %v1134_v12 = vpop.permute.xlu0 %1133  ;;  %v1139_v13 = vpop.permute.xlu1 %1138 }
 0x2da   : > { %v1136_v14 = vunpack.i.h.bf16 %v1134_v12  ;;  %v1135_v15 = vunpack.i.l.bf16 %v1134_v12  ;;  %v1141_v16 = vunpack.i.h.bf16 %v1139_v13  ;;  %v1140_v17 = vunpack.i.l.bf16 %v1139_v13 }
 0x2dc   : > { %v609_v19 = vsel %vm366_vm2, %v1135_v15, %v1136_v14  ;;  %v610_v24 = vsel %vm366_vm2, %v1140_v17, %v1141_v16 }
 0x2dd   : > { %v1144_v20 = vpop.permute.xlu0 %1143  ;;  %v998_v21 = vpack.c.bf16 %v609_v19, %v608_v18 }
 0x2de   : > { %v1146_v22 = vunpack.i.h.bf16 %v1144_v20  ;;  %v1145_v23 = vunpack.i.l.bf16 %v1144_v20 }
 0x2df   : > { %999 = vmatprep.subr.bf16.mxu1 %v998_v21 }
 0x2e0   : > { %1001 = vmatpush3.bf16.msra.mxu1 %v998_v21  ;;  %v611_v25 = vsel %vm366_vm2, %v1145_v23, %v1146_v22 }
 0x2e1   : > { %v1002_v26 = vpack.c.bf16 %v611_v25, %v610_v24 }
 0x2e3   : > { %1003 = vmatprep.subr.bf16.mxu1 %v1002_v26 }
 0x2e4   : > { %1005 = vmatpush3.bf16.msra.mxu1 %v1002_v26 }
 0x2e7   : > { %961 = vmatmul.mubr.msk.f32.vlgmr.msra.gmra.mrb[0].mxu1 %vm624_vm4, %v491_v27 }
 0x2ea   : > { %v553_v31 = vpop.permute.xlu1 %552 }
 0x2ee   : > { %v558_v29 = vpop.permute.xlu0 %557 }
 0x2ef   : > { %v721_v40 = vpop.permute.xlu1 %720 }
 0x2f2   : > { %v726_v38 = vpop.permute.xlu0 %725 }
 0x3ba   : > { %v962_v30 = vpop.f32.mrb[0].mxu1 }
 0x3bb   : > { %v703_v3 = vadd.f32 %v962_v30, %v558_v29  ;;  %v697_v32 = vpop.f32.mrb[1].mxu1 }
 0x3bc   : > { %v698_v33 = vadd.f32 %v697_v32, %v553_v31 }
 0x3bd   : > { %v707_v34 = vmax.f32 %v703_v3, 0.0 }
 0x3be   : > { %v706_v35 = vmax.f32 %v698_v33, 0.0 }
 0x3c0   : > { %v1006_v36 = vpack.c.bf16 %v707_v34, %v706_v35 }
 0x3c2   : > { %1008 = vmatprep.subr.msk.bf16.mxu0 %vm1007_vm6, %v1006_v36 }
 0x3c3   : > { %1011 = vmatpush3.bf16.msk.msra.mxu0 %vm1007_vm6, %v1006_v36 }
 0x3c6   : > { %968 = vmatmul.mubr.msk.f32.vlgmr.msra.gmra.mrb[4].mxu0 %vm728_vm5, %v713_v37 }
 0x499   : > { %v969_v39 = vpop.f32.mrb[4].mxu0 }
 0x49a   : > { %v807_v41 = vadd.f32 %v969_v39, %v726_v38  ;;  %v801_v52 = vpop.f32.mrb[5].mxu0 }
 0x49b   : > { %v802_v42 = vadd.f32 %v801_v52, %v721_v40 }
 0x49c   : > { %811 = vst [vmem:[%s278_s27 + $0x8] sm:$0xff] %v807_v41 }
 0x49d   : > { %810 = vst [vmem:[%s278_s27] sm:$0xff] %v802_v42 }
 0x49e PF: > { %s17_s24 = sadd.s32 1, %s1153_s24  }
 0x49f   : > { %p14_p4 = scmp.ge.s32.totalorder %s17_s24, 4  }
 0x4a1   :  { %16 = sbr.rel (!%p14_p4) target bundleno = 1 (0x1), region = 78 }

// kernel: model_forward.4
= control target key start
LH: loop header
LB: loop body
LE: loop exit
PB: predicated region body
PF: predicated region fallthrough
CT: control target
= control target key end

     0   :  { %s1677_s17 = smov 0   ;;  %s1875_s0 = inlined_call_operand.vmem [shape: f32[2,16,128], index: 0, kind: input, shape index: {}]   ;;  %s1876_s1 = inlined_call_operand.vmem [shape: f32[16,48], index: 1, kind: input, shape index: {}]   ;;  %s1877_s2 = inlined_call_operand.vmem [shape: f32[16,1], index: 2, kind: input, shape index: {}]   ;;  %s1878_s3 = inlined_call_operand.vmem [shape: f32[16,48], index: 3, kind: input, shape index: {}]   ;;  %s1879_s4 = inlined_call_operand.vmem [shape: f32[16,1], index: 4, kind: input, shape index: {}]   ;;  %s1880_s5 = inlined_call_operand.vmem [shape: f32[16,48], index: 5, kind: input, shape index: {}]   ;;  %s1881_s6 = inlined_call_operand.vmem [shape: f32[16,1], index: 6, kind: input, shape index: {}]   ;;  %s1882_s7 = inlined_call_operand.vmem [shape: f32[32,48], index: 7, kind: input, shape index: {}]   ;;  %s1883_s8 = inlined_call_operand.vmem [shape: f32[32,1], index: 8, kind: input, shape index: {}]   ;;  %s1884_s9 = inlined_call_operand.vmem [shape: f32[16,32], index: 9, kind: input, shape index: {}]   ;;  %s1885_s10 = inlined_call_operand.vmem [shape: f32[16,1], index: 10, kind: input, shape index: {}]   ;;  %s1886_s11 = inlined_call_operand.vmem [shape: f32[2,16,128], index: 11, kind: output, shape index: {}]  }
   0x1 LB: > { %s1226_s18 = sadd.s32 4294967295, %s1610_s17   ;;  %p1230_p0 = scmp.ge.s32.totalorder %s1610_s17, 1  ;;  %s1610_s17 = sphi %s1677_s17, %s21_s17  }
   0x2   : > { %p337_p1 = scmp.lt.s32.totalorder %s1610_s17, 3 }
   0x4   : > { %p338_p2 = pnand %p1230_p0, %p337_p1 }
   0x5   : > { %p377_p3 = scmp.lt.s32.totalorder (!%p338_p2), %s1226_s18, 1  ;;  %v1612_v3 = vmov (!%p338_p2), 0.0   ;;  %s1613_s23 = smov (!%p338_p2), 127   ;;  %vm425_vm0 = vcmask (!%p338_p2), 1031168   ;;  %v399_v13 = vld [vmem:[%s1876_s1] sm:$0xff] (!%p338_p2)  ;;  %vm471_vm1 = vcmask (!%p338_p2), 392192   ;;  %v555_v46 = vlaneseq (!%p338_p2) }
   0x6   : > { %341 = sbr.rel (%p338_p2) target bundleno = 2114 (0x842), region = 64  ;;  %s1614_s24 = smov (!%p338_p2), 126   ;;  %1307 = vmatprep.mubr.msk.f32.mxu0 (!%p338_p2), %vm471_vm1, %v399_v13  ;;  %vm460_vm2 = vcmask (!%p338_p2), 7168   ;;  %v1616_v22 = vmov (!%p338_p2), 0   ;;  %v402_v28 = vld [vmem:[%s1877_s2 + $0x8] sm:$0xff] (!%p338_p2)  ;;  %v401_v30 = vld [vmem:[%s1877_s2] sm:$0xff] (!%p338_p2) }
   0x7   : > { %s1615_s25 = smov (!%p338_p2), 1   ;;  %1483 = vset.pattern.permute.xlu1 (!%p338_p2), %v1616_v22  ;;  %1482 = vset.pattern.permute.xlu0 (!%p338_p2), %v1616_v22  ;;  %v400_v45 = vld [vmem:[%s1876_s1 + $0x8] sm:$0xff] (!%p338_p2)  ;;  %v1725_v48 = vand.u32 (!%p338_p2), 127, %v555_v46  ;;  %vm1087_vm4 = vcmask (!%p338_p2), 261120  }
   0x9   : > { %vm557_vm3 = vcmp.lt.s32.totalorder (!%p338_p2), %v1725_v48, 8 }
   0xa   : > { %vm1418_vm5 = vmpackc.low (!%p338_p2), %vm557_vm3, %vm557_vm3 }
   0xd   : > { %s1888_s18 = smov (!%p377_p3, %s1226_s18), 1 }
   0xe   : > { %s1249_s19 = sshll.u32 %s1888_s18, 4 }
   0xf   : > { %s381_s22 = scalar_lea.vmem %s1875_s0, %s1249_s19 }
  0x10   : > { %v395_v0 = vld [vmem:[%s381_s22] sm:$0xff]  ;;  %v396_v1 = vld [vmem:[%s381_s22 + $0x8] sm:$0xff] }
  0x11   : > { %v1442_v2 = vpack.i.bf16 %v396_v1, %v395_v0  ;;  %v1452_v4 = vpack.i.bf16 %v1612_v3, %v396_v1  ;;  %v1447_v5 = vpack.i.bf16 %v1612_v3, %v395_v0  ;;  %v1457_v6 = vpack.i.bf16 %v395_v0, %v1612_v3 }
  0x12   : > { %v1462_v7 = vpack.i.bf16 %v396_v1, %v1612_v3 }
  0x13   : > { %1443 = vrot.lane.b32.xlu0 %v1442_v2, %s1613_s23  ;;  %1453 = vrot.lane.b32.xlu1 %v1452_v4, %s1614_s24 }
  0x17   : > { %1448 = vrot.lane.b32.xlu0 %v1447_v5, %s1614_s24  ;;  %1458 = vrot.lane.b32.xlu1 %v1457_v6, %s1615_s25  ;;  %v562_v5 = vld [vmem:[%s1878_s3] sm:$0xff] }
  0x18   : > { %1322 = vmatprep.mubr.msk.f32.mxu1 %vm471_vm1, %v562_v5 }
  0x1b   : > { %1463 = vrot.lane.b32.xlu0 %v1462_v7, %s1615_s25 }
  0x85   : > { %v1444_v8 = vpop.permute.xlu0 %1443  ;;  %v1454_v9 = vpop.permute.xlu1 %1453 }
  0x86   : > { %v1456_v10 = vunpack.i.h.bf16 %v1454_v9  ;;  %v1455_v11 = vunpack.i.l.bf16 %v1454_v9  ;;  %1468 = vrot.lane.b32.xlu1 %v1444_v8, %s1615_s25 }
  0x88   : > { %v427_v12 = vsel %vm425_vm0, %v1455_v11, %v1456_v10 }
  0x89   : > { %v1477_v14 = vpack.i.bf16 %v427_v12, %v1455_v11  ;;  %v1449_v15 = vpop.permute.xlu0 %1448  ;;  %v1459_v16 = vpop.permute.xlu1 %1458 }
  0x8a   : > { %v1451_v17 = vunpack.i.h.bf16 %v1449_v15  ;;  %v1450_v18 = vunpack.i.l.bf16 %v1449_v15  ;;  %v1461_v19 = vunpack.i.h.bf16 %v1459_v16  ;;  %v1460_v20 = vunpack.i.l.bf16 %v1459_v16 }
  0x8b   : > { %1478 = vrot.lane.b32.xlu1 %v1477_v14, %s1615_s25  ;;  %v564_v14 = vld [vmem:[%s1879_s4] sm:$0xff] }
  0x8c   : > { %v426_v21 = vsel %vm425_vm0, %v1450_v18, %v1451_v17  ;;  %v461_v27 = vsel %vm460_vm2, %v1460_v20, %v1461_v19 }
  0x8d   : > { %v1472_v23 = vpack.i.bf16 %v426_v21, %v1450_v18  ;;  %v1464_v24 = vpop.permute.xlu0 %1463  ;;  %v565_v21 = vld [vmem:[%s1879_s4 + $0x8] sm:$0xff] }
  0x8e   : > { %v1466_v25 = vunpack.i.h.bf16 %v1464_v24  ;;  %v1465_v26 = vunpack.i.l.bf16 %v1464_v24 }
  0x8f   : > { %1473 = vrot.lane.b32.xlu0 %v1472_v23, %s1615_s25  ;;  %435 = vperm.xlu1 %1483, %v402_v28  }
  0x90   : > { %v462_v29 = vsel %vm460_vm2, %v1465_v26, %v1466_v25 }
  0x91   : > { %v1369_v31 = vpack.c.bf16 %v462_v29, %v461_v27 }
  0x93   : > { %1370 = vmatprep.subr.bf16.mxu0 %v1369_v31  ;;  %430 = vperm.xlu0 %1482, %v401_v30  }
  0x94   : > { %1372 = vmatpush3.bf16.msra.mxu0 %v1369_v31 }
  0xf8   : > { %v1469_v32 = vpop.permute.xlu1 %1468 }
  0xf9   : > { %v1471_v33 = vunpack.i.h.bf16 %v1469_v32  ;;  %v1470_v34 = vunpack.i.l.bf16 %v1469_v32 }
  0xfb   : > { %v1373_v35 = vpack.c.bf16 %v1471_v33, %v1470_v34 }
  0xfd   : > { %v1479_v36 = vpop.permute.xlu1 %1478  ;;  %1374 = vmatprep.subr.bf16.mxu0 %v1373_v35 }
  0xfe   : > { %v1481_v37 = vunpack.i.h.bf16 %v1479_v36  ;;  %v1480_v38 = vunpack.i.l.bf16 %v1479_v36  ;;  %1376 = vmatpush3.bf16.msra.mxu0 %v1373_v35  ;;  %v563_v36 = vld [vmem:[%s1878_s3 + $0x8] sm:$0xff] }
 0x100   : > { %v464_v42 = vsel %vm460_vm2, %v1480_v38, %v1481_v37 }
 0x101   : > { %v1474_v39 = vpop.permute.xlu0 %1473 }
 0x102   : > { %v1476_v40 = vunpack.i.h.bf16 %v1474_v39  ;;  %v1475_v41 = vunpack.i.l.bf16 %v1474_v39 }
 0x104   : > { %v463_v43 = vsel %vm460_vm2, %v1475_v41, %v1476_v40 }
 0x105   : > { %v1377_v44 = vpack.c.bf16 %v464_v42, %v463_v43 }
 0x107   : > { %1378 = vmatprep.subr.bf16.mxu0 %v1377_v44 }
 0x108   : > { %1380 = vmatpush3.bf16.msra.mxu0 %v1377_v44 }
 0x10b   : > { %1308 = vmatmul.mubr.msk.f32.vlgmr.msra.gmra.mrb[0].mxu0 %vm471_vm1, %v400_v45 }
 0x10e   : > { %v436_v47 = vpop.permute.xlu1 %435 }
 0x112   : > { %v431_v49 = vpop.permute.xlu0 %430 }
 0x1de   : > { %v1309_v50 = vpop.f32.mrb[0].mxu0 }
 0x1df   : > { %v550_v51 = vadd.f32 %v1309_v50, %v436_v47  ;;  %v544_v52 = vpop.f32.mrb[1].mxu0 }
 0x1e0   : > { %v545_v53 = vadd.f32 %v544_v52, %v431_v49 }
 0x1e1   : > { %v554_v54 = vmax.f32 %v550_v51, 0.0 }
 0x1e2   : > { %v553_v55 = vmax.f32 %v545_v53, 0.0 }
 0x1e3   : > { %v559_v56 = vsel %vm557_vm3, %v554_v54, 0.0 }
 0x1e4   : > { %v558_v57 = vsel %vm557_vm3, %v553_v55, 0.0  ;;  %v1494_v61 = vpack.i.bf16 %v1612_v3, %v559_v56  ;;  %v1499_v62 = vpack.i.bf16 %v559_v56, %v1612_v3 }
 0x1e5   : > { %v1489_v58 = vpack.i.bf16 %v1612_v3, %v558_v57  ;;  %v1484_v59 = vpack.i.bf16 %v559_v56, %v558_v57  ;;  %v1504_v60 = vpack.i.bf16 %v558_v57, %v1612_v3 }
 0x1e7   : > { %1490 = vrot.lane.b32.xlu0 %v1489_v58, %s1614_s24  ;;  %1485 = vrot.lane.b32.xlu1 %v1484_v59, %s1613_s23  ;;  %v719_v58 = vld [vmem:[%s1880_s5] sm:$0xff] }
 0x1e8   : > { %1337 = vmatprep.mubr.msk.f32.mxu0 %vm471_vm1, %v719_v58 }
 0x1eb   : > { %1505 = vrot.lane.b32.xlu0 %v1504_v60, %s1615_s25  ;;  %1495 = vrot.lane.b32.xlu1 %v1494_v61, %s1614_s24 }
 0x1ef   : > { %1500 = vrot.lane.b32.xlu1 %v1499_v62, %s1615_s25 }
 0x259   : > { %v1491_v63 = vpop.permute.xlu0 %1490  ;;  %v1486_v0 = vpop.permute.xlu1 %1485 }
 0x25a   : > { %v1493_v1 = vunpack.i.h.bf16 %v1491_v63  ;;  %v1492_v2 = vunpack.i.l.bf16 %v1491_v63  ;;  %1510 = vrot.lane.b32.xlu0 %v1486_v0, %s1615_s25 }
 0x25c   : > { %v588_v4 = vsel %vm425_vm0, %v1492_v2, %v1493_v1 }
 0x25d   : > { %v1514_v6 = vpack.i.bf16 %v588_v4, %v1492_v2  ;;  %v1506_v7 = vpop.permute.xlu0 %1505  ;;  %v1496_v8 = vpop.permute.xlu1 %1495  ;;  %v721_v4 = vld [vmem:[%s1881_s6] sm:$0xff] }
 0x25e   : > { %v1498_v9 = vunpack.i.h.bf16 %v1496_v8  ;;  %v1497_v10 = vunpack.i.l.bf16 %v1496_v8  ;;  %v1508_v11 = vunpack.i.h.bf16 %v1506_v7  ;;  %v1507_v12 = vunpack.i.l.bf16 %v1506_v7 }
 0x25f   : > { %1515 = vrot.lane.b32.xlu1 %v1514_v6, %s1615_s25 }
 0x260   : > { %v589_v13 = vsel %vm425_vm0, %v1497_v10, %v1498_v9  ;;  %v622_v19 = vsel %vm460_vm2, %v1507_v12, %v1508_v11  ;;  %v722_v11 = vld [vmem:[%s1881_s6 + $0x8] sm:$0xff] }
 0x261   : > { %v1519_v15 = vpack.i.bf16 %v589_v13, %v1497_v10  ;;  %v1501_v16 = vpop.permute.xlu1 %1500 }
 0x262   : > { %v1503_v17 = vunpack.i.h.bf16 %v1501_v16  ;;  %v1502_v18 = vunpack.i.l.bf16 %v1501_v16 }
 0x263   : > { %592 = vperm.xlu1 %1483, %v564_v14   ;;  %1520 = vrot.lane.b32.xlu0 %v1519_v15, %s1615_s25 }
 0x264   : > { %v623_v20 = vsel %vm460_vm2, %v1502_v18, %v1503_v17 }
 0x265   : > { %v1381_v22 = vpack.c.bf16 %v623_v20, %v622_v19 }
 0x267   : > { %1382 = vmatprep.subr.bf16.mxu1 %v1381_v22  ;;  %597 = vperm.xlu0 %1482, %v565_v21  }
 0x268   : > { %1384 = vmatpush3.bf16.msra.mxu1 %v1381_v22 }
 0x2cc   : > { %v1511_v23 = vpop.permute.xlu0 %1510 }
 0x2cd   : > { %v1513_v24 = vunpack.i.h.bf16 %v1511_v23  ;;  %v1512_v25 = vunpack.i.l.bf16 %v1511_v23 }
 0x2cf   : > { %v1385_v27 = vpack.c.bf16 %v1513_v24, %v1512_v25 }
 0x2d1   : > { %v1516_v26 = vpop.permute.xlu1 %1515  ;;  %1386 = vmatprep.subr.bf16.mxu1 %v1385_v27 }
 0x2d2   : > { %v1518_v28 = vunpack.i.h.bf16 %v1516_v26  ;;  %v1517_v29 = vunpack.i.l.bf16 %v1516_v26  ;;  %1388 = vmatpush3.bf16.msra.mxu1 %v1385_v27  ;;  %v720_v26 = vld [vmem:[%s1880_s5 + $0x8] sm:$0xff] }
 0x2d4   : > { %v624_v33 = vsel %vm460_vm2, %v1517_v29, %v1518_v28 }
 0x2d5   : > { %v1521_v30 = vpop.permute.xlu0 %1520 }
 0x2d6   : > { %v1523_v31 = vunpack.i.h.bf16 %v1521_v30  ;;  %v1522_v32 = vunpack.i.l.bf16 %v1521_v30 }
 0x2d8   : > { %v625_v34 = vsel %vm460_vm2, %v1522_v32, %v1523_v31 }
 0x2d9   : > { %v1389_v35 = vpack.c.bf16 %v625_v34, %v624_v33 }
 0x2db   : > { %1390 = vmatprep.subr.bf16.mxu1 %v1389_v35 }
 0x2dc   : > { %1392 = vmatpush3.bf16.msra.mxu1 %v1389_v35 }
 0x2df   : > { %1323 = vmatmul.mubr.msk.f32.vlgmr.msra.gmra.mrb[0].mxu1 %vm471_vm1, %v563_v36 }
 0x2e2   : > { %v593_v39 = vpop.permute.xlu1 %592 }
 0x2e6   : > { %v598_v37 = vpop.permute.xlu0 %597 }
 0x3b2   : > { %v1324_v38 = vpop.f32.mrb[0].mxu1 }
 0x3b3   : > { %v710_v40 = vadd.f32 %v1324_v38, %v598_v37  ;;  %v704_v41 = vpop.f32.mrb[1].mxu1 }
 0x3b4   : > { %v705_v42 = vadd.f32 %v704_v41, %v593_v39 }
 0x3b5   : > { %v714_v43 = vmax.f32 %v710_v40, 0.0 }
 0x3b6   : > { %v713_v44 = vmax.f32 %v705_v42, 0.0 }
 0x3b7   : > { %v716_v45 = vsel %vm557_vm3, %v714_v43, 0.0 }
 0x3b8   : > { %v715_v46 = vsel %vm557_vm3, %v713_v44, 0.0  ;;  %v1534_v51 = vpack.i.bf16 %v1612_v3, %v716_v45  ;;  %v1539_v52 = vpack.i.bf16 %v716_v45, %v1612_v3 }
 0x3b9   : > { %v1529_v47 = vpack.i.bf16 %v1612_v3, %v715_v46  ;;  %v1524_v49 = vpack.i.bf16 %v716_v45, %v715_v46  ;;  %v1544_v50 = vpack.i.bf16 %v715_v46, %v1612_v3 }
 0x3bb   : > { %1530 = vrot.lane.b32.xlu0 %v1529_v47, %s1614_s24  ;;  %1525 = vrot.lane.b32.xlu1 %v1524_v49, %s1613_s23  ;;  %v876_v47 = vld [vmem:[%s1882_s7] sm:$0xff] }
 0x3bc   : > { %1352 = vmatprep.mubr.msk.f32.mxu1 %vm471_vm1, %v876_v47 }
 0x3bf   : > { %1545 = vrot.lane.b32.xlu0 %v1544_v50, %s1615_s25  ;;  %1535 = vrot.lane.b32.xlu1 %v1534_v51, %s1614_s24 }
 0x3c3   : > { %1540 = vrot.lane.b32.xlu1 %v1539_v52, %s1615_s25 }
 0x42d   : > { %v1531_v53 = vpop.permute.xlu0 %1530  ;;  %v1526_v54 = vpop.permute.xlu1 %1525 }
 0x42e   : > { %v1533_v55 = vunpack.i.h.bf16 %v1531_v53  ;;  %v1532_v56 = vunpack.i.l.bf16 %v1531_v53  ;;  %1550 = vrot.lane.b32.xlu0 %v1526_v54, %s1615_s25 }
 0x430   : > { %v745_v57 = vsel %vm425_vm0, %v1532_v56, %v1533_v55 }
 0x431   : > { %v1554_v59 = vpack.i.bf16 %v745_v57, %v1532_v56  ;;  %v1546_v60 = vpop.permute.xlu0 %1545  ;;  %v1536_v61 = vpop.permute.xlu1 %1535  ;;  %v880_v56 = vld [vmem:[%s1883_s8] sm:$0xff] }
 0x432   : > { %v1538_v62 = vunpack.i.h.bf16 %v1536_v61  ;;  %v1537_v63 = vunpack.i.l.bf16 %v1536_v61  ;;  %v1548_v0 = vunpack.i.h.bf16 %v1546_v60  ;;  %v1547_v1 = vunpack.i.l.bf16 %v1546_v60  ;;  %v882_v61 = vld [vmem:[%s1883_s8 + $0x10] sm:$0xff] }
 0x433   : > { %1555 = vrot.lane.b32.xlu1 %v1554_v59, %s1615_s25 }
 0x434   : > { %v746_v2 = vsel %vm425_vm0, %v1537_v63, %v1538_v62  ;;  %v779_v9 = vsel %vm460_vm2, %v1547_v1, %v1548_v0  ;;  %v881_v1 = vld [vmem:[%s1883_s8 + $0x8] sm:$0xff] }
 0x435   : > { %v1559_v5 = vpack.i.bf16 %v746_v2, %v1537_v63  ;;  %v1541_v6 = vpop.permute.xlu1 %1540  ;;  %v1071_v2 = vld [vmem:[%s1885_s10] sm:$0xff] }
 0x436   : > { %v1543_v7 = vunpack.i.h.bf16 %v1541_v6  ;;  %v1542_v8 = vunpack.i.l.bf16 %v1541_v6 }
 0x437   : > { %749 = vperm.xlu1 %1483, %v721_v4   ;;  %1560 = vrot.lane.b32.xlu0 %v1559_v5, %s1615_s25  ;;  %v883_v4 = vld [vmem:[%s1883_s8 + $0x18] sm:$0xff]  ;;  %v1072_v5 = vld [vmem:[%s1885_s10 + $0x8] sm:$0xff] }
 0x438   : > { %v780_v10 = vsel %vm460_vm2, %v1542_v8, %v1543_v7 }
 0x439   : > { %v1393_v12 = vpack.c.bf16 %v780_v10, %v779_v9 }
 0x43b   : > { %1394 = vmatprep.subr.bf16.mxu0 %v1393_v12  ;;  %754 = vperm.xlu0 %1482, %v722_v11  }
 0x43c   : > { %1396 = vmatpush3.bf16.msra.mxu0 %v1393_v12 }
 0x4a0   : > { %v1551_v13 = vpop.permute.xlu0 %1550 }
 0x4a1   : > { %v1553_v14 = vunpack.i.h.bf16 %v1551_v13  ;;  %v1552_v15 = vunpack.i.l.bf16 %v1551_v13 }
 0x4a3   : > { %v1397_v17 = vpack.c.bf16 %v1553_v14, %v1552_v15 }
 0x4a5   : > { %v1556_v16 = vpop.permute.xlu1 %1555  ;;  %1398 = vmatprep.subr.bf16.mxu0 %v1397_v17 }
 0x4a6   : > { %v1558_v18 = vunpack.i.h.bf16 %v1556_v16  ;;  %v1557_v19 = vunpack.i.l.bf16 %v1556_v16  ;;  %1400 = vmatpush3.bf16.msra.mxu0 %v1397_v17 }
 0x4a8   : > { %v781_v23 = vsel %vm460_vm2, %v1557_v19, %v1558_v18  ;;  %v877_v19 = vld [vmem:[%s1882_s7 + $0x8] sm:$0xff] }
 0x4a9   : > { %v1561_v20 = vpop.permute.xlu0 %1560 }
 0x4aa   : > { %v1563_v21 = vunpack.i.h.bf16 %v1561_v20  ;;  %v1562_v22 = vunpack.i.l.bf16 %v1561_v20  ;;  %v878_v20 = vld [vmem:[%s1882_s7 + $0x10] sm:$0xff] }
 0x4ac   : > { %v782_v24 = vsel %vm460_vm2, %v1562_v22, %v1563_v21  ;;  %v879_v21 = vld [vmem:[%s1882_s7 + $0x18] sm:$0xff]  ;;  %v1069_v22 = vld [vmem:[%s1884_s9] sm:$0xff] }
 0x4ad   : > { %v1401_v25 = vpack.c.bf16 %v782_v24, %v781_v23 }
 0x4af   : > { %1402 = vmatprep.subr.bf16.mxu0 %v1401_v25 }
 0x4b0   : > { %1404 = vmatpush3.bf16.msra.mxu0 %v1401_v25 }
 0x4b3   : > { %1338 = vmatmul.mubr.msk.f32.vlgmr.msra.gmra.mrb[2].mxu0 %vm471_vm1, %v720_v26 }
 0x4b4   : > { %1366 = vmatprep.mubr.msk.f32.mxu0 %vm1087_vm4, %v1069_v22 }
 0x4b6   : > { %v750_v29 = vpop.permute.xlu1 %749 }
 0x4ba   : > { %v755_v27 = vpop.permute.xlu0 %754 }
 0x586   : > { %v1339_v28 = vpop.f32.mrb[2].mxu0 }
 0x587   : > { %v867_v30 = vadd.f32 %v1339_v28, %v755_v27  ;;  %v861_v31 = vpop.f32.mrb[3].mxu0 }
 0x588   : > { %v862_v32 = vadd.f32 %v861_v31, %v750_v29 }
 0x589   : > { %v871_v33 = vmax.f32 %v867_v30, 0.0 }
 0x58a   : > { %v870_v34 = vmax.f32 %v862_v32, 0.0 }
 0x58b   : > { %v873_v35 = vsel %vm557_vm3, %v871_v33, 0.0 }
 0x58c   : > { %v872_v36 = vsel %vm557_vm3, %v870_v34, 0.0  ;;  %v1574_v40 = vpack.i.bf16 %v1612_v3, %v873_v35  ;;  %v1579_v41 = vpack.i.bf16 %v873_v35, %v1612_v3 }
 0x58d   : > { %v1569_v37 = vpack.i.bf16 %v1612_v3, %v872_v36  ;;  %v1564_v38 = vpack.i.bf16 %v873_v35, %v872_v36  ;;  %v1584_v39 = vpack.i.bf16 %v872_v36, %v1612_v3 }
 0x58f   : > { %1570 = vrot.lane.b32.xlu0 %v1569_v37, %s1614_s24  ;;  %1565 = vrot.lane.b32.xlu1 %v1564_v38, %s1613_s23 }
 0x593   : > { %1585 = vrot.lane.b32.xlu0 %v1584_v39, %s1615_s25  ;;  %1575 = vrot.lane.b32.xlu1 %v1574_v40, %s1614_s24 }
 0x597   : > { %1580 = vrot.lane.b32.xlu1 %v1579_v41, %s1615_s25  ;;  %v1070_v41 = vld [vmem:[%s1884_s9 + $0x8] sm:$0xff] }
 0x601   : > { %v1571_v42 = vpop.permute.xlu0 %1570  ;;  %v1566_v43 = vpop.permute.xlu1 %1565 }
 0x602   : > { %v1573_v44 = vunpack.i.h.bf16 %v1571_v42  ;;  %v1572_v45 = vunpack.i.l.bf16 %v1571_v42  ;;  %1590 = vrot.lane.b32.xlu0 %v1566_v43, %s1615_s25 }
 0x604   : > { %v906_v46 = vsel %vm425_vm0, %v1572_v45, %v1573_v44 }
 0x605   : > { %v1594_v49 = vpack.i.bf16 %v906_v46, %v1572_v45  ;;  %v1586_v50 = vpop.permute.xlu0 %1585  ;;  %v1576_v51 = vpop.permute.xlu1 %1575 }
 0x606   : > { %v1578_v52 = vunpack.i.h.bf16 %v1576_v51  ;;  %v1577_v53 = vunpack.i.l.bf16 %v1576_v51  ;;  %v1588_v3 = vunpack.i.h.bf16 %v1586_v50  ;;  %v1587_v54 = vunpack.i.l.bf16 %v1586_v50 }
 0x607   : > { %1595 = vrot.lane.b32.xlu1 %v1594_v49, %s1615_s25 }
 0x608   : > { %v907_v55 = vsel %vm425_vm0, %v1577_v53, %v1578_v52  ;;  %v950_v62 = vsel %vm460_vm2, %v1587_v54, %v1588_v3 }
 0x609   : > { %v1599_v57 = vpack.i.bf16 %v907_v55, %v1577_v53  ;;  %v1581_v58 = vpop.permute.xlu1 %1580 }
 0x60a   : > { %v1583_v59 = vunpack.i.h.bf16 %v1581_v58  ;;  %v1582_v60 = vunpack.i.l.bf16 %v1581_v58 }
 0x60b   : > { %910 = vperm.xlu1 %1483, %v880_v56   ;;  %1600 = vrot.lane.b32.xlu0 %v1599_v57, %s1615_s25  ;;  %s386_s25 = scalar_lea.vmem %s1886_s11, %s1249_s19 }
 0x60c   : > { %v951_v63 = vsel %vm460_vm2, %v1582_v60, %v1583_v59 }
 0x60d   : > { %v1405_v0 = vpack.c.bf16 %v951_v63, %v950_v62 }
 0x60f   : > { %920 = vperm.xlu1 %1483, %v882_v61   ;;  %1406 = vmatprep.subr.bf16.mxu1 %v1405_v0 }
 0x610   : > { %915 = vperm.xlu0 %1482, %v881_v1   ;;  %1408 = vmatpush3.bf16.msra.mxu1 %v1405_v0 }
 0x613   : > { %1079 = vperm.xlu1 %1483, %v1071_v2  }
 0x614   : > { %925 = vperm.xlu0 %1482, %v883_v4  }
 0x618   : > { %1084 = vperm.xlu0 %1482, %v1072_v5  }
 0x674   : > { %v1591_v6 = vpop.permute.xlu0 %1590 }
 0x675   : > { %v1593_v7 = vunpack.i.h.bf16 %v1591_v6  ;;  %v1592_v8 = vunpack.i.l.bf16 %v1591_v6 }
 0x677   : > { %v1409_v10 = vpack.c.bf16 %v1593_v7, %v1592_v8 }
 0x679   : > { %v1596_v9 = vpop.permute.xlu1 %1595  ;;  %1410 = vmatprep.subr.bf16.mxu1 %v1409_v10 }
 0x67a   : > { %v1598_v11 = vunpack.i.h.bf16 %v1596_v9  ;;  %v1597_v12 = vunpack.i.l.bf16 %v1596_v9  ;;  %1412 = vmatpush3.bf16.msra.mxu1 %v1409_v10 }
 0x67c   : > { %v952_v16 = vsel %vm460_vm2, %v1597_v12, %v1598_v11 }
 0x67d   : > { %v1601_v13 = vpop.permute.xlu0 %1600 }
 0x67e   : > { %v1603_v14 = vunpack.i.h.bf16 %v1601_v13  ;;  %v1602_v15 = vunpack.i.l.bf16 %v1601_v13 }
 0x680   : > { %v953_v17 = vsel %vm460_vm2, %v1602_v15, %v1603_v14 }
 0x681   : > { %v1413_v18 = vpack.c.bf16 %v953_v17, %v952_v16 }
 0x683   : > { %1414 = vmatprep.subr.bf16.mxu1 %v1413_v18 }
 0x684   : > { %1416 = vmatpush3.bf16.msra.mxu1 %v1413_v18 }
 0x687   : > { %1353 = vmatmul.mubr.msk.f32.vlgmr.msra.gmra.mrb[2].mxu1 %vm471_vm1, %v877_v19 }
 0x688   : > { %1355 = vmatprep.mubr.msk.f32.mxu1 %vm471_vm1, %v878_v20 }
 0x68a   : > { %v911_v24 = vpop.permute.xlu1 %910 }
 0x68b   : > { %1356 = vmatmul.mubr.msk.f32.gmra.mrb[4].mxu1 %vm471_vm1, %v879_v21 }
 0x68e   : > { %v921_v33 = vpop.permute.xlu1 %920 }
 0x68f   : > { %v916_v23 = vpop.permute.xlu0 %915 }
 0x692   : > { %v1080_v43 = vpop.permute.xlu1 %1079 }
 0x693   : > { %v926_v30 = vpop.permute.xlu0 %925 }
 0x697   : > { %v1085_v42 = vpop.permute.xlu0 %1084 }
 0x75a   : > { %v1354_v25 = vpop.f32.mrb[2].mxu1 }
 0x75b   : > { %v1044_v26 = vadd.f32 %v1354_v25, %v916_v23  ;;  %v1038_v27 = vpop.f32.mrb[3].mxu1 }
 0x75c   : > { %v1039_v28 = vadd.f32 %v1038_v27, %v911_v24 }
 0x75d   : > { %v1058_v29 = vmax.f32 %v1044_v26, 0.0 }
 0x75e   : > { %v1057_v31 = vmax.f32 %v1039_v28, 0.0  ;;  %v1357_v32 = vpop.f32.mrb[4].mxu1 }
 0x75f   : > { %v1054_v34 = vadd.f32 %v1357_v32, %v926_v30  ;;  %v1048_v35 = vpop.f32.mrb[5].mxu1 }
 0x760   : > { %v1417_v36 = vpack.c.bf16 %v1058_v29, %v1057_v31  ;;  %v1049_v37 = vadd.f32 %v1048_v35, %v921_v33 }
 0x761   : > { %v1060_v38 = vmax.f32 %v1054_v34, 0.0 }
 0x762   : > { %v1059_v39 = vmax.f32 %v1049_v37, 0.0  ;;  %1419 = vmatprep.subr.msk.bf16.mxu0 %vm1418_vm5, %v1417_v36 }
 0x763   : > { %1422 = vmatpush3.bf16.msk.msra.mxu0 %vm1418_vm5, %v1417_v36 }
 0x764   : > { %v1423_v40 = vpack.c.bf16 %v1060_v38, %v1059_v39 }
 0x766   : > { %1425 = vmatprep.subr.msk.bf16.mxu0 %vm1418_vm5, %v1423_v40 }
 0x767   : > { %1428 = vmatpush3.bf16.msk.msra.mxu0 %vm1418_vm5, %v1423_v40 }
 0x76a   : > { %1367 = vmatmul.mubr.msk.f32.vlgmr.msra.gmra.mrb[4].mxu0 %vm1087_vm4, %v1070_v41 }
 0x83d   : > { %v1368_v48 = vpop.f32.mrb[4].mxu0 }
 0x83e   : > { %v1166_v44 = vadd.f32 %v1368_v48, %v1085_v42  ;;  %v1160_v45 = vpop.f32.mrb[5].mxu0 }
 0x83f   : > { %v1161_v46 = vadd.f32 %v1160_v45, %v1080_v43 }
 0x840   : > { %1170 = vst [vmem:[%s386_s25 + $0x8] sm:$0xff] %v1166_v44 }
 0x841   : > { %1169 = vst [vmem:[%s386_s25] sm:$0xff] %v1161_v46 }
 0x842 PF: > { %s21_s17 = sadd.s32 1, %s1610_s17  }
 0x843   : > { %p18_p4 = scmp.ge.s32.totalorder %s21_s17, 4  }
 0x845   :  { %20 = sbr.rel (!%p18_p4) target bundleno = 1 (0x1), region = 94 }

</bundles_post_ra>
